<compile_context>
chip_gen: v6e
topology: v6e:2x2x1
jax: 0.10.0
libtpu: 0.0.40
codegen_flags: <defaults>
</compile_context>

<pallas_src>
import functools

import numpy as np

import jax
import jax.numpy as jnp
from jax.experimental import pallas as pl
from jax.experimental.pallas import tpu as pltpu


def _vmem():
    return pl.BlockSpec(memory_space=pltpu.MemorySpace.VMEM)


def _smem():
    return pl.BlockSpec(memory_space=pltpu.MemorySpace.SMEM)


# ----------------------------- in-kernel helpers -----------------------------


def _row_tap(pref, dy, stride, ho):
    """Rows dy, dy+s, ..., dy+s*(ho-1) of a (N, Hp, W*C) padded scratch,
    flattened to (N*ho, W*C).  The lane dim is untouched -> no lane relayout."""
    if stride == 1:
        t = pref[:, dy:dy + ho, :]
    else:
        t = pref[:, pl.ds(dy, ho, stride), :]
    n, _, lanes = t.shape
    return t.reshape(n * ho, lanes)


def _batchnorm(h, fold, bcast, gamma, beta, count):
    """Training-mode CustomBatchNorm on a lane-dense (rows, W*C) value.

    Per-channel sums are folded out of the lane dim with a tiny constant matmul
    (rides the otherwise idle MXU), stats use a single pass (sum / sum-of-sq,
    unbiased variance, clamp 1e-6), the per-channel scale/shift are broadcast
    back to lanes with a second tiny matmul, and the normalization itself is a
    single FMA per element with an EUP rsqrt."""
    lane_sum = jnp.sum(h, axis=0, keepdims=True)
    lane_ssq = jnp.sum(h * h, axis=0, keepdims=True)
    s1 = jnp.dot(lane_sum, fold, preferred_element_type=jnp.float32)   # (1, C)
    s2 = jnp.dot(lane_ssq, fold, preferred_element_type=jnp.float32)   # (1, C)
    mean = s1 * (1.0 / count)
    var = (s2 - count * mean * mean) * (1.0 / (count - 1))
    scale = gamma * jax.lax.rsqrt(jnp.maximum(var, 1e-6))
    shift = beta - mean * scale
    scale_l = jnp.dot(scale, bcast, preferred_element_type=jnp.float32)
    shift_l = jnp.dot(shift, bcast, preferred_element_type=jnp.float32)
    return h * scale_l + shift_l


# ----------------------------- fused kernel ----------------------------------


def _resblock_kernel(x_ref, w1b_ref, w2b_ref, bsc_ref, f1_ref, b1_ref,
                     f2_ref, b2_ref, scal_ref, o_ref, pad1_ref, pad2_ref,
                     *, stride, dims):
    n, cin, h, w, cout, ho, wo, wp = dims
    count = n * ho * wo                        # BN sample count per channel

    # ---- scatter NCHW x into the zero-padded, channel-major lane-dense scratch
    #      pad1[n, 1+y, c*wp + 1 + x] = x[n, c, y, x]  (one small store / channel)
    pad1_ref[...] = jnp.zeros(pad1_ref.shape, pad1_ref.dtype)
    xv = x_ref[...]
    for c in range(cin):
        pad1_ref[:, 1:1 + h, c * wp + 1:c * wp + 1 + w] = xv[:, c, :, :]

    # ---- conv1 + folded 1x1/identity shortcut: 3 accumulated row-tap matmuls
    #      against banded bf16 weights (dx taps + stride live in the bands).
    #      Conv biases omitted: cancelled by training-mode BN mean subtraction.
    acc1 = jnp.zeros((n * ho, 2 * wo * cout), jnp.float32)
    for dy in range(3):
        tap = _row_tap(pad1_ref, dy, stride, ho).astype(jnp.bfloat16)
        acc1 = acc1 + jnp.dot(tap, w1b_ref[dy],
                              preferred_element_type=jnp.float32)
    h1 = acc1[:, :wo * cout]                      # width-major lanes  (j*Cout+co)
    sc = acc1[:, wo * cout:] + bsc_ref[...]       # channel-major lanes (co*Wo+j)

    # ---- BN1 + ReLU (all lane-dense FMAs, stays in vregs)
    h1 = jnp.maximum(
        _batchnorm(h1, f1_ref[...], b1_ref[...], scal_ref[0], scal_ref[1],
                   count), 0.0)

    # ---- conv2: 3x3, stride 1, pad 1, same banded scheme on the lane-dense h1
    pad2_ref[...] = jnp.zeros(pad2_ref.shape, pad2_ref.dtype)
    pad2_ref[:, 1:1 + ho, cout:cout + wo * cout] = h1.reshape(n, ho, wo * cout)
    acc2 = jnp.zeros((n * ho, wo * cout), jnp.float32)
    for dy in range(3):
        tap = pad2_ref[:, dy:dy + ho, :].reshape(
            n * ho, (wo + 2) * cout).astype(jnp.bfloat16)
        acc2 = acc2 + jnp.dot(tap, w2b_ref[dy],
                              preferred_element_type=jnp.float32)

    # ---- BN2 (no ReLU), residual add, final ReLU — channel-major lane-dense
    h2 = _batchnorm(acc2, f2_ref[...], b2_ref[...], scal_ref[2], scal_ref[3],
                    count)
    y = jnp.maximum(h2 + sc, 0.0)

    # ---- store straight into NCHW: channel co lives in lanes [co*Wo,(co+1)*Wo)
    for co in range(cout):
        o_ref[:, co, :, :] = y[:, co * wo:(co + 1) * wo].reshape(n, ho, wo)


# ----------------------------- wrapper ----------------------------------------


def _banded_weights(w1, ws, w2, cin, cout, wo, wp, stride):
    """Expand the 3x3 / 1x1 conv weights into per-dy banded matrices that act
    directly on the lane-dense padded activations.

    conv1 rows  : pad1 lane c*wp + (dx + stride*j)
    conv1 cols  : [0, Wo*Cout)           width-major   (j*Cout + co)
    shortcut    : centre tap (dx=1) of the dy=1 band, written into a second,
                  channel-major output panel [Wo*Cout, 2*Wo*Cout).
    conv2 rows  : pad2 lane (dx + j)*Cout + ci
    conv2 cols  : channel-major (co*Wo + j)  -> final NCHW store is lane slices.
    """
    dy, dx, c, co, j = np.meshgrid(np.arange(3), np.arange(3), np.arange(cin),
                                   np.arange(cout), np.arange(wo),
                                   indexing="ij")
    w1b = jnp.zeros((3, cin * wp, 2 * wo * cout), jnp.float32)
    w1b = w1b.at[dy, c * wp + dx + stride * j, j * cout + co].set(
        w1[dy, dx, c, co])
    c, co, j = np.meshgrid(np.arange(cin), np.arange(cout), np.arange(wo),
                           indexing="ij")
    w1b = w1b.at[1, c * wp + 1 + stride * j,
                 wo * cout + co * wo + j].set(ws[c, co])

    dy, dx, ci, co, j = np.meshgrid(np.arange(3), np.arange(3),
                                    np.arange(cout), np.arange(cout),
                                    np.arange(wo), indexing="ij")
    w2b = jnp.zeros((3, (wo + 2) * cout, wo * cout), jnp.float32)
    w2b = w2b.at[dy, (dx + j) * cout + ci, co * wo + j].set(
        w2[dy, dx, ci, co])
    return w1b.astype(jnp.bfloat16), w2b.astype(jnp.bfloat16)


def res_block_forward(x_nchw, params, stride=1):
    """Pallas implementation of ResBlock.forward (training-mode batchnorm).

    x_nchw: (N, Cin, H, W) float32 (PyTorch layout); returns (N, Cout, Ho, Wo).
    """
    n, cin, h, w = x_nchw.shape
    w1 = params["w1"]
    cout = w1.shape[-1]
    has_proj = params.get("ws") is not None
    if not has_proj and (cin != cout or stride != 1):
        raise ValueError("identity shortcut requires in_channels == out_channels"
                         " and stride == 1 (same constraint as the PyTorch "
                         "module)")
    ho = (h - 1) // stride + 1
    wo = (w - 1) // stride + 1
    wp = w + 2
    hp = max(h + 2, 2 + stride * ho)     # strided row taps never read OOB

    # identity shortcut == 1x1 conv with identity weight and zero bias
    ws = params["ws"] if has_proj else jnp.eye(cout, dtype=jnp.float32)
    bs = params["bs"] if has_proj else jnp.zeros((cout,), jnp.float32)
    w1b, w2b = _banded_weights(w1, ws, params["w2"], cin, cout, wo, wp, stride)
    bsc = jnp.repeat(bs.astype(jnp.float32), wo)[None, :]        # (1, Cout*Wo)

    # lane<->channel fold / broadcast matrices for BN (ride the idle MXU)
    lane = np.arange(wo * cout)
    f1_np = np.zeros((wo * cout, cout), np.float32)
    f1_np[lane, lane % cout] = 1.0                 # width-major lanes  -> channel
    f2_np = np.zeros((wo * cout, cout), np.float32)
    f2_np[lane, lane // wo] = 1.0                  # channel-major lanes -> channel
    f1, b1 = jnp.asarray(f1_np), jnp.asarray(f1_np.T.copy())
    f2, b2 = jnp.asarray(f2_np), jnp.asarray(f2_np.T.copy())

    scal = jnp.stack([params["gamma1"], params["beta1"],
                      params["gamma2"], params["beta2"]]).astype(jnp.float32)
    # NOTE: conv biases b1/b2 are intentionally not passed (cancelled by
    # training-mode BN); the shortcut bias is not followed by BN and is kept.

    out_shape = jax.ShapeDtypeStruct((n, cout, ho, wo), jnp.float32)
    scratch = [pltpu.VMEM((n, hp, cin * wp), jnp.float32),
               pltpu.VMEM((n, ho + 2, (wo + 2) * cout), jnp.float32)]

    operands = (x_nchw.astype(jnp.float32), w1b, w2b, bsc, f1, b1, f2, b2, scal)
    in_specs = [_vmem()] * 8 + [_smem()]

    # VMEM budget derived from the real footprint (v7x physical VMEM is 64 MiB).
    def _nbytes(a):
        return int(np.prod(a.shape)) * np.dtype(a.dtype).itemsize

    foot = (sum(_nbytes(a) for a in operands[:-1]) + _nbytes(out_shape)
            + n * hp * cin * wp * 4 + n * (ho + 2) * (wo + 2) * cout * 4)
    budget = 2 * foot + (2 << 20)
    if budget > (48 << 20):
        # TODO(synk): gridded two-phase BN reduction for >VMEM activations.
        raise ValueError("activation does not fit the single-invocation VMEM "
                         "budget; gridded two-phase BN variant not implemented")
    vmem_limit = int(min(max(budget, 8 << 20), 48 << 20))

    out = pl.pallas_call(
        functools.partial(_resblock_kernel, stride=stride,
                          dims=(n, cin, h, w, cout, ho, wo, wp)),
        out_shape=out_shape,
        in_specs=in_specs,
        out_specs=_vmem(),
        scratch_shapes=scratch,
        compiler_params=pltpu.CompilerParams(vmem_limit_bytes=vmem_limit),
    )(*operands)
    return out


# ----------------------------- pure-JAX reference ------------------------------


def res_block_ref(x_nchw, params, stride=1):
    x = jnp.transpose(x_nchw, (0, 2, 3, 1))

    def conv(xx, wgt, b, s, pad):
        y = jax.lax.conv_general_dilated(
            xx, wgt, (s, s), [(pad, pad), (pad, pad)],
            dimension_numbers=("NHWC", "HWIO", "NHWC"))
        return y + b

    def bn(xx, gamma, beta, relu):
        cnt = xx.shape[0] * xx.shape[1] * xx.shape[2]
        mean = jnp.mean(xx, axis=(0, 1, 2), keepdims=True)
        var = jnp.sum((xx - mean) ** 2, axis=(0, 1, 2), keepdims=True) / (cnt - 1)
        y = gamma * (xx - mean) / jnp.sqrt(jnp.maximum(var, 1e-6)) + beta
        return jnp.maximum(y, 0.0) if relu else y

    hh = conv(x, params["w1"], params["b1"], stride, 1)
    hh = bn(hh, params["gamma1"], params["beta1"], True)
    hh = conv(hh, params["w2"], params["b2"], 1, 1)
    hh = bn(hh, params["gamma2"], params["beta2"], False)
    if params.get("ws") is not None:
        sc = conv(x, params["ws"][None, None], params["bs"], stride, 0)
    else:
        sc = x
    return jnp.transpose(jnp.maximum(hh + sc, 0.0), (0, 3, 1, 2))


# ----------------------------- main -------------------------------------------


def _make_params(key, cin, cout, with_shortcut):
    k = jax.random.split(key, 8)
    p = {
        "w1": 0.1 * jax.random.normal(k[0], (3, 3, cin, cout), jnp.float32),
        "b1": 0.1 * jax.random.normal(k[1], (cout,), jnp.float32),
        "w2": 0.1 * jax.random.normal(k[2], (3, 3, cout, cout), jnp.float32),
        "b2": 0.1 * jax.random.normal(k[3], (cout,), jnp.float32),
        # scalar gamma ~ U[0,1), beta = 0 (matches CustomBatchNorm.__init__)
        "gamma1": jax.random.uniform(k[4], (), jnp.float32),
        "beta1": jnp.zeros((), jnp.float32),
        "gamma2": jax.random.uniform(k[5], (), jnp.float32),
        "beta2": jnp.zeros((), jnp.float32),
        "ws": None,
        "bs": None,
    }
    if with_shortcut:
        p["ws"] = 0.1 * jax.random.normal(k[6], (cin, cout), jnp.float32)
        p["bs"] = 0.1 * jax.random.normal(k[7], (cout,), jnp.float32)
    return p


def _check(out, ref, shape, tag):
    assert out.shape == shape, (tag, out.shape)
    # bf16 MXU operands (f32 accumulation) -> tolerance loosened from the f32
    # kernel's 1e-4 to 3e-2; observed error is a few 1e-3.
    assert jnp.allclose(out, ref, rtol=3e-2, atol=3e-2), (
        tag, float(jnp.max(jnp.abs(out - ref))))


if __name__ == "__main__":
    key = jax.random.PRNGKey(0)
    k_x, k_p1, k_p2, k_p3 = jax.random.split(key, 4)
    n, hs, ws_ = 2, 16, 16

    # Config A: Cin != Cout -> 1x1 projection shortcut, stride 1.
    params_a = _make_params(k_p1, 4, 8, with_shortcut=True)
    x_a = jax.random.normal(k_x, (n, 4, hs, ws_), jnp.float32)          # NCHW
    out_a = jax.block_until_ready(res_block_forward(x_a, params_a, stride=1))
    ref_a = jax.block_until_ready(res_block_ref(x_a, params_a, stride=1))
    _check(out_a, ref_a, (n, 8, hs, ws_), "A")

    # Config B: Cin == Cout -> identity shortcut path.
    params_b = _make_params(k_p2, 8, 8, with_shortcut=False)
    x_b = jax.random.normal(k_x, (n, 8, hs, ws_), jnp.float32)
    out_b = jax.block_until_ready(res_block_forward(x_b, params_b, stride=1))
    ref_b = jax.block_until_ready(res_block_ref(x_b, params_b, stride=1))
    _check(out_b, ref_b, (n, 8, hs, ws_), "B")

    # Config C: stride 2 downsampling block with projection shortcut.
    params_c = _make_params(k_p3, 4, 8, with_shortcut=True)
    x_c = jax.random.normal(k_x, (n, 4, hs, ws_), jnp.float32)
    out_c = jax.block_until_ready(res_block_forward(x_c, params_c, stride=2))
    ref_c = jax.block_until_ready(res_block_ref(x_c, params_c, stride=2))
    _check(out_c, ref_c, (n, 8, hs // 2, ws_ // 2), "C")

    print("KERNEL_OK")
</pallas_src>

<mosaic_0001>
module attributes {stable_mosaic.version = 11 : i64} {
  func.func @_resblock_kernel(%arg0: memref<2x4x16x16xf32, #tpu.memory_space<vmem>>, %arg1: memref<3x72x256xbf16, #tpu.memory_space<vmem>>, %arg2: memref<3x144x128xbf16, #tpu.memory_space<vmem>>, %arg3: memref<1x128xf32, #tpu.memory_space<vmem>>, %arg4: memref<128x8xf32, #tpu.memory_space<vmem>>, %arg5: memref<8x128xf32, #tpu.memory_space<vmem>>, %arg6: memref<128x8xf32, #tpu.memory_space<vmem>>, %arg7: memref<8x128xf32, #tpu.memory_space<vmem>>, %arg8: memref<4xf32, #tpu.memory_space<smem>>, %arg9: memref<2x8x16x16xf32, #tpu.memory_space<vmem>>, %arg10: memref<2x18x72xf32, #tpu.memory_space<vmem>>, %arg11: memref<2x18x144xf32, #tpu.memory_space<vmem>>) attributes {dimension_semantics = [], scalar_prefetch = 0 : i64, scratch_operands = 2 : i64, tpu.core_type = #tpu.core_type<tc>} {
    %cst = arith.constant 0.000000e+00 : f32
    %0 = vector.broadcast %cst : f32 to vector<2x18x72xf32>
    %c0 = arith.constant 0 : index
    %c0_0 = arith.constant 0 : index
    %c0_1 = arith.constant 0 : index
    %1 = vector.load %arg10[%c0, %c0_0, %c0_1] : memref<2x18x72xf32, #tpu.memory_space<vmem>>, vector<2x18x72xf32>
    tpu.vector_store %arg10[%c0, %c0_0, %c0_1], %0 {strides = array<i32>} : memref<2x18x72xf32, #tpu.memory_space<vmem>>, vector<2x18x72xf32>,
    %c0_2 = arith.constant 0 : index
    %c0_3 = arith.constant 0 : index
    %c0_4 = arith.constant 0 : index
    %c0_5 = arith.constant 0 : index
    %2 = vector.load %arg0[%c0_2, %c0_3, %c0_4, %c0_5] : memref<2x4x16x16xf32, #tpu.memory_space<vmem>>, vector<2x4x16x16xf32>
    %3 = vector.extract_strided_slice %2 {offsets = [0, 0, 0, 0], sizes = [2, 1, 16, 16], strides = [1, 1, 1, 1]} : vector<2x4x16x16xf32> to vector<2x1x16x16xf32>
    %4 = vector.shape_cast %3 : vector<2x1x16x16xf32> to vector<2x16x16xf32>
    %c0_6 = arith.constant 0 : index
    %c1 = arith.constant 1 : index
    %c1_7 = arith.constant 1 : index
    %5 = vector.load %arg10[%c0_6, %c1, %c1_7] : memref<2x18x72xf32, #tpu.memory_space<vmem>>, vector<2x16x16xf32>
    tpu.vector_store %arg10[%c0_6, %c1, %c1_7], %4 {strides = array<i32>} : memref<2x18x72xf32, #tpu.memory_space<vmem>>, vector<2x16x16xf32>,
    %6 = vector.extract_strided_slice %2 {offsets = [0, 1, 0, 0], sizes = [2, 1, 16, 16], strides = [1, 1, 1, 1]} : vector<2x4x16x16xf32> to vector<2x1x16x16xf32>
    %7 = vector.shape_cast %6 : vector<2x1x16x16xf32> to vector<2x16x16xf32>
    %c0_8 = arith.constant 0 : index
    %c1_9 = arith.constant 1 : index
    %c19 = arith.constant 19 : index
    %8 = vector.load %arg10[%c0_8, %c1_9, %c19] : memref<2x18x72xf32, #tpu.memory_space<vmem>>, vector<2x16x16xf32>
    tpu.vector_store %arg10[%c0_8, %c1_9, %c19], %7 {strides = array<i32>} : memref<2x18x72xf32, #tpu.memory_space<vmem>>, vector<2x16x16xf32>,
    %9 = vector.extract_strided_slice %2 {offsets = [0, 2, 0, 0], sizes = [2, 1, 16, 16], strides = [1, 1, 1, 1]} : vector<2x4x16x16xf32> to vector<2x1x16x16xf32>
    %10 = vector.shape_cast %9 : vector<2x1x16x16xf32> to vector<2x16x16xf32>
    %c0_10 = arith.constant 0 : index
    %c1_11 = arith.constant 1 : index
    %c37 = arith.constant 37 : index
    %11 = vector.load %arg10[%c0_10, %c1_11, %c37] : memref<2x18x72xf32, #tpu.memory_space<vmem>>, vector<2x16x16xf32>
    tpu.vector_store %arg10[%c0_10, %c1_11, %c37], %10 {strides = array<i32>} : memref<2x18x72xf32, #tpu.memory_space<vmem>>, vector<2x16x16xf32>,
    %12 = vector.extract_strided_slice %2 {offsets = [0, 3, 0, 0], sizes = [2, 1, 16, 16], strides = [1, 1, 1, 1]} : vector<2x4x16x16xf32> to vector<2x1x16x16xf32>
    %13 = vector.shape_cast %12 : vector<2x1x16x16xf32> to vector<2x16x16xf32>
    %c0_12 = arith.constant 0 : index
    %c1_13 = arith.constant 1 : index
    %c55 = arith.constant 55 : index
    %14 = vector.load %arg10[%c0_12, %c1_13, %c55] : memref<2x18x72xf32, #tpu.memory_space<vmem>>, vector<2x16x16xf32>
    tpu.vector_store %arg10[%c0_12, %c1_13, %c55], %13 {strides = array<i32>} : memref<2x18x72xf32, #tpu.memory_space<vmem>>, vector<2x16x16xf32>,
    %cst_14 = arith.constant 0.000000e+00 : f32
    %15 = vector.broadcast %cst_14 : f32 to vector<32x256xf32>
    %c0_15 = arith.constant 0 : index
    %c0_16 = arith.constant 0 : index
    %c0_17 = arith.constant 0 : index
    %16 = vector.load %arg10[%c0_15, %c0_16, %c0_17] : memref<2x18x72xf32, #tpu.memory_space<vmem>>, vector<2x16x72xf32>
    %17 = vector.shape_cast %16 : vector<2x16x72xf32> to vector<32x72xf32>
    %18 = arith.truncf %17 : vector<32x72xf32> to vector<32x72xbf16>
    %c0_18 = arith.constant 0 : index
    %c0_19 = arith.constant 0 : index
    %c0_20 = arith.constant 0 : index
    %19 = vector.load %arg1[%c0_18, %c0_19, %c0_20] : memref<3x72x256xbf16, #tpu.memory_space<vmem>>, vector<1x72x256xbf16>
    %20 = vector.shape_cast %19 : vector<1x72x256xbf16> to vector<72x256xbf16>
    %cst_21 = arith.constant dense<0.000000e+00> : vector<32x256xf32>
    %21 = tpu.matmul %18, %20, %cst_21 {dimension_numbers = #tpu.dot_dimension_numbers<[1], [0], [0], [1], [0, 0, 1, 1], [], []>} : vector<32x72xbf16>, vector<72x256xbf16>, vector<32x256xf32> -> vector<32x256xf32>
    %22 = arith.addf %15, %21 : vector<32x256xf32>
    %c0_22 = arith.constant 0 : index
    %c1_23 = arith.constant 1 : index
    %c0_24 = arith.constant 0 : index
    %23 = vector.load %arg10[%c0_22, %c1_23, %c0_24] : memref<2x18x72xf32, #tpu.memory_space<vmem>>, vector<2x16x72xf32>
    %24 = vector.shape_cast %23 : vector<2x16x72xf32> to vector<32x72xf32>
    %25 = arith.truncf %24 : vector<32x72xf32> to vector<32x72xbf16>
    %c1_25 = arith.constant 1 : index
    %c0_26 = arith.constant 0 : index
    %c0_27 = arith.constant 0 : index
    %26 = vector.load %arg1[%c1_25, %c0_26, %c0_27] : memref<3x72x256xbf16, #tpu.memory_space<vmem>>, vector<1x72x256xbf16>
    %27 = vector.shape_cast %26 : vector<1x72x256xbf16> to vector<72x256xbf16>
    %cst_28 = arith.constant dense<0.000000e+00> : vector<32x256xf32>
    %28 = tpu.matmul %25, %27, %cst_28 {dimension_numbers = #tpu.dot_dimension_numbers<[1], [0], [0], [1], [0, 0, 1, 1], [], []>} : vector<32x72xbf16>, vector<72x256xbf16>, vector<32x256xf32> -> vector<32x256xf32>
    %29 = arith.addf %22, %28 : vector<32x256xf32>
    %c0_29 = arith.constant 0 : index
    %c2 = arith.constant 2 : index
    %c0_30 = arith.constant 0 : index
    %30 = vector.load %arg10[%c0_29, %c2, %c0_30] : memref<2x18x72xf32, #tpu.memory_space<vmem>>, vector<2x16x72xf32>
    %31 = vector.shape_cast %30 : vector<2x16x72xf32> to vector<32x72xf32>
    %32 = arith.truncf %31 : vector<32x72xf32> to vector<32x72xbf16>
    %c2_31 = arith.constant 2 : index
    %c0_32 = arith.constant 0 : index
    %c0_33 = arith.constant 0 : index
    %33 = vector.load %arg1[%c2_31, %c0_32, %c0_33] : memref<3x72x256xbf16, #tpu.memory_space<vmem>>, vector<1x72x256xbf16>
    %34 = vector.shape_cast %33 : vector<1x72x256xbf16> to vector<72x256xbf16>
    %cst_34 = arith.constant dense<0.000000e+00> : vector<32x256xf32>
    %35 = tpu.matmul %32, %34, %cst_34 {dimension_numbers = #tpu.dot_dimension_numbers<[1], [0], [0], [1], [0, 0, 1, 1], [], []>} : vector<32x72xbf16>, vector<72x256xbf16>, vector<32x256xf32> -> vector<32x256xf32>
    %36 = arith.addf %29, %35 : vector<32x256xf32>
    %37 = vector.extract_strided_slice %36 {offsets = [0, 0], sizes = [32, 128], strides = [1, 1]} : vector<32x256xf32> to vector<32x128xf32>
    %38 = vector.extract_strided_slice %36 {offsets = [0, 128], sizes = [32, 128], strides = [1, 1]} : vector<32x256xf32> to vector<32x128xf32>
    %c0_35 = arith.constant 0 : index
    %c0_36 = arith.constant 0 : index
    %39 = vector.load %arg3[%c0_35, %c0_36] : memref<1x128xf32, #tpu.memory_space<vmem>>, vector<1x128xf32>
    %40 = vector.broadcast %39 : vector<1x128xf32> to vector<32x128xf32>
    %41 = arith.addf %38, %40 : vector<32x128xf32>
    %c0_37 = arith.constant 0 : index
    %c0_38 = arith.constant 0 : index
    %42 = vector.load %arg4[%c0_37, %c0_38] : memref<128x8xf32, #tpu.memory_space<vmem>>, vector<128x8xf32>
    %c0_39 = arith.constant 0 : index
    %c0_40 = arith.constant 0 : index
    %43 = vector.load %arg5[%c0_39, %c0_40] : memref<8x128xf32, #tpu.memory_space<vmem>>, vector<8x128xf32>
    %c0_41 = arith.constant 0 : index
    %44 = memref.load %arg8[%c0_41] : memref<4xf32, #tpu.memory_space<smem>>
    %c1_42 = arith.constant 1 : index
    %45 = memref.load %arg8[%c1_42] : memref<4xf32, #tpu.memory_space<smem>>
    %cst_43 = arith.constant dense<0.000000e+00> : vector<128xf32>
    %46 = vector.multi_reduction <add>, %37, %cst_43 [0] : vector<32x128xf32> to vector<128xf32>
    %47 = vector.shape_cast %46 : vector<128xf32> to vector<1x128xf32>
    %48 = arith.mulf %37, %37 : vector<32x128xf32>
    %cst_44 = arith.constant dense<0.000000e+00> : vector<128xf32>
    %49 = vector.multi_reduction <add>, %48, %cst_44 [0] : vector<32x128xf32> to vector<128xf32>
    %50 = vector.shape_cast %49 : vector<128xf32> to vector<1x128xf32>
    %cst_45 = arith.constant dense<0.000000e+00> : vector<1x8xf32>
    %51 = tpu.matmul %47, %42, %cst_45 {dimension_numbers = #tpu.dot_dimension_numbers<[1], [0], [0], [1], [0, 0, 1, 1], [], []>} : vector<1x128xf32>, vector<128x8xf32>, vector<1x8xf32> -> vector<1x8xf32>
    %cst_46 = arith.constant dense<0.000000e+00> : vector<1x8xf32>
    %52 = tpu.matmul %50, %42, %cst_46 {dimension_numbers = #tpu.dot_dimension_numbers<[1], [0], [0], [1], [0, 0, 1, 1], [], []>} : vector<1x128xf32>, vector<128x8xf32>, vector<1x8xf32> -> vector<1x8xf32>
    %cst_47 = arith.constant 0.001953125 : f32
    %53 = vector.broadcast %cst_47 : f32 to vector<1x8xf32>
    %54 = arith.mulf %51, %53 : vector<1x8xf32>
    %cst_48 = arith.constant 5.120000e+02 : f32
    %55 = vector.broadcast %cst_48 : f32 to vector<1x8xf32>
    %56 = arith.mulf %55, %54 : vector<1x8xf32>
    %57 = arith.mulf %56, %54 : vector<1x8xf32>
    %58 = arith.subf %52, %57 : vector<1x8xf32>
    %cst_49 = arith.constant 0.00195694715 : f32
    %59 = vector.broadcast %cst_49 : f32 to vector<1x8xf32>
    %60 = arith.mulf %58, %59 : vector<1x8xf32>
    %cst_50 = arith.constant 9.99999997E-7 : f32
    %61 = vector.broadcast %cst_50 : f32 to vector<1x8xf32>
    %62 = arith.maximumf %60, %61 : vector<1x8xf32>
    %63 = math.rsqrt %62 : vector<1x8xf32>
    %64 = vector.broadcast %44 : f32 to vector<1x8xf32>
    %65 = arith.mulf %64, %63 : vector<1x8xf32>
    %66 = arith.mulf %54, %65 : vector<1x8xf32>
    %67 = vector.broadcast %45 : f32 to vector<1x8xf32>
    %68 = arith.subf %67, %66 : vector<1x8xf32>
    %cst_51 = arith.constant dense<0.000000e+00> : vector<1x128xf32>
    %69 = tpu.matmul %65, %43, %cst_51 {dimension_numbers = #tpu.dot_dimension_numbers<[1], [0], [0], [1], [0, 0, 1, 1], [], []>} : vector<1x8xf32>, vector<8x128xf32>, vector<1x128xf32> -> vector<1x128xf32>
    %cst_52 = arith.constant dense<0.000000e+00> : vector<1x128xf32>
    %70 = tpu.matmul %68, %43, %cst_52 {dimension_numbers = #tpu.dot_dimension_numbers<[1], [0], [0], [1], [0, 0, 1, 1], [], []>} : vector<1x8xf32>, vector<8x128xf32>, vector<1x128xf32> -> vector<1x128xf32>
    %71 = vector.broadcast %69 : vector<1x128xf32> to vector<32x128xf32>
    %72 = arith.mulf %37, %71 : vector<32x128xf32>
    %73 = vector.broadcast %70 : vector<1x128xf32> to vector<32x128xf32>
    %74 = arith.addf %72, %73 : vector<32x128xf32>
    %cst_53 = arith.constant 0.000000e+00 : f32
    %75 = vector.broadcast %cst_53 : f32 to vector<32x128xf32>
    %76 = arith.maximumf %74, %75 : vector<32x128xf32>
    %cst_54 = arith.constant 0.000000e+00 : f32
    %77 = vector.broadcast %cst_54 : f32 to vector<2x18x144xf32>
    %c0_55 = arith.constant 0 : index
    %c0_56 = arith.constant 0 : index
    %c0_57 = arith.constant 0 : index
    %78 = vector.load %arg11[%c0_55, %c0_56, %c0_57] : memref<2x18x144xf32, #tpu.memory_space<vmem>>, vector<2x18x144xf32>
    tpu.vector_store %arg11[%c0_55, %c0_56, %c0_57], %77 {strides = array<i32>} : memref<2x18x144xf32, #tpu.memory_space<vmem>>, vector<2x18x144xf32>,
    %79 = vector.shape_cast %76 : vector<32x128xf32> to vector<2x16x128xf32>
    %c0_58 = arith.constant 0 : index
    %c1_59 = arith.constant 1 : index
    %c8 = arith.constant 8 : index
    %80 = vector.load %arg11[%c0_58, %c1_59, %c8] : memref<2x18x144xf32, #tpu.memory_space<vmem>>, vector<2x16x128xf32>
    tpu.vector_store %arg11[%c0_58, %c1_59, %c8], %79 {strides = array<i32>} : memref<2x18x144xf32, #tpu.memory_space<vmem>>, vector<2x16x128xf32>,
    %cst_60 = arith.constant 0.000000e+00 : f32
    %81 = vector.broadcast %cst_60 : f32 to vector<32x128xf32>
    %c0_61 = arith.constant 0 : index
    %c0_62 = arith.constant 0 : index
    %c0_63 = arith.constant 0 : index
    %82 = vector.load %arg11[%c0_61, %c0_62, %c0_63] : memref<2x18x144xf32, #tpu.memory_space<vmem>>, vector<2x16x144xf32>
    %83 = vector.shape_cast %82 : vector<2x16x144xf32> to vector<32x144xf32>
    %84 = arith.truncf %83 : vector<32x144xf32> to vector<32x144xbf16>
    %c0_64 = arith.constant 0 : index
    %c0_65 = arith.constant 0 : index
    %c0_66 = arith.constant 0 : index
    %85 = vector.load %arg2[%c0_64, %c0_65, %c0_66] : memref<3x144x128xbf16, #tpu.memory_space<vmem>>, vector<1x144x128xbf16>
    %86 = vector.shape_cast %85 : vector<1x144x128xbf16> to vector<144x128xbf16>
    %cst_67 = arith.constant dense<0.000000e+00> : vector<32x128xf32>
    %87 = tpu.matmul %84, %86, %cst_67 {dimension_numbers = #tpu.dot_dimension_numbers<[1], [0], [0], [1], [0, 0, 1, 1], [], []>} : vector<32x144xbf16>, vector<144x128xbf16>, vector<32x128xf32> -> vector<32x128xf32>
    %88 = arith.addf %81, %87 : vector<32x128xf32>
    %c0_68 = arith.constant 0 : index
    %c1_69 = arith.constant 1 : index
    %c0_70 = arith.constant 0 : index
    %89 = vector.load %arg11[%c0_68, %c1_69, %c0_70] : memref<2x18x144xf32, #tpu.memory_space<vmem>>, vector<2x16x144xf32>
    %90 = vector.shape_cast %89 : vector<2x16x144xf32> to vector<32x144xf32>
    %91 = arith.truncf %90 : vector<32x144xf32> to vector<32x144xbf16>
    %c1_71 = arith.constant 1 : index
    %c0_72 = arith.constant 0 : index
    %c0_73 = arith.constant 0 : index
    %92 = vector.load %arg2[%c1_71, %c0_72, %c0_73] : memref<3x144x128xbf16, #tpu.memory_space<vmem>>, vector<1x144x128xbf16>
    %93 = vector.shape_cast %92 : vector<1x144x128xbf16> to vector<144x128xbf16>
    %cst_74 = arith.constant dense<0.000000e+00> : vector<32x128xf32>
    %94 = tpu.matmul %91, %93, %cst_74 {dimension_numbers = #tpu.dot_dimension_numbers<[1], [0], [0], [1], [0, 0, 1, 1], [], []>} : vector<32x144xbf16>, vector<144x128xbf16>, vector<32x128xf32> -> vector<32x128xf32>
    %95 = arith.addf %88, %94 : vector<32x128xf32>
    %c0_75 = arith.constant 0 : index
    %c2_76 = arith.constant 2 : index
    %c0_77 = arith.constant 0 : index
    %96 = vector.load %arg11[%c0_75, %c2_76, %c0_77] : memref<2x18x144xf32, #tpu.memory_space<vmem>>, vector<2x16x144xf32>
    %97 = vector.shape_cast %96 : vector<2x16x144xf32> to vector<32x144xf32>
    %98 = arith.truncf %97 : vector<32x144xf32> to vector<32x144xbf16>
    %c2_78 = arith.constant 2 : index
    %c0_79 = arith.constant 0 : index
    %c0_80 = arith.constant 0 : index
    %99 = vector.load %arg2[%c2_78, %c0_79, %c0_80] : memref<3x144x128xbf16, #tpu.memory_space<vmem>>, vector<1x144x128xbf16>
    %100 = vector.shape_cast %99 : vector<1x144x128xbf16> to vector<144x128xbf16>
    %cst_81 = arith.constant dense<0.000000e+00> : vector<32x128xf32>
    %101 = tpu.matmul %98, %100, %cst_81 {dimension_numbers = #tpu.dot_dimension_numbers<[1], [0], [0], [1], [0, 0, 1, 1], [], []>} : vector<32x144xbf16>, vector<144x128xbf16>, vector<32x128xf32> -> vector<32x128xf32>
    %102 = arith.addf %95, %101 : vector<32x128xf32>
    %c0_82 = arith.constant 0 : index
    %c0_83 = arith.constant 0 : index
    %103 = vector.load %arg6[%c0_82, %c0_83] : memref<128x8xf32, #tpu.memory_space<vmem>>, vector<128x8xf32>
    %c0_84 = arith.constant 0 : index
    %c0_85 = arith.constant 0 : index
    %104 = vector.load %arg7[%c0_84, %c0_85] : memref<8x128xf32, #tpu.memory_space<vmem>>, vector<8x128xf32>
    %c2_86 = arith.constant 2 : index
    %105 = memref.load %arg8[%c2_86] : memref<4xf32, #tpu.memory_space<smem>>
    %c3 = arith.constant 3 : index
    %106 = memref.load %arg8[%c3] : memref<4xf32, #tpu.memory_space<smem>>
    %cst_87 = arith.constant dense<0.000000e+00> : vector<128xf32>
    %107 = vector.multi_reduction <add>, %102, %cst_87 [0] : vector<32x128xf32> to vector<128xf32>
    %108 = vector.shape_cast %107 : vector<128xf32> to vector<1x128xf32>
    %109 = arith.mulf %102, %102 : vector<32x128xf32>
    %cst_88 = arith.constant dense<0.000000e+00> : vector<128xf32>
    %110 = vector.multi_reduction <add>, %109, %cst_88 [0] : vector<32x128xf32> to vector<128xf32>
    %111 = vector.shape_cast %110 : vector<128xf32> to vector<1x128xf32>
    %cst_89 = arith.constant dense<0.000000e+00> : vector<1x8xf32>
    %112 = tpu.matmul %108, %103, %cst_89 {dimension_numbers = #tpu.dot_dimension_numbers<[1], [0], [0], [1], [0, 0, 1, 1], [], []>} : vector<1x128xf32>, vector<128x8xf32>, vector<1x8xf32> -> vector<1x8xf32>
    %cst_90 = arith.constant dense<0.000000e+00> : vector<1x8xf32>
    %113 = tpu.matmul %111, %103, %cst_90 {dimension_numbers = #tpu.dot_dimension_numbers<[1], [0], [0], [1], [0, 0, 1, 1], [], []>} : vector<1x128xf32>, vector<128x8xf32>, vector<1x8xf32> -> vector<1x8xf32>
    %cst_91 = arith.constant 0.001953125 : f32
    %114 = vector.broadcast %cst_91 : f32 to vector<1x8xf32>
    %115 = arith.mulf %112, %114 : vector<1x8xf32>
    %cst_92 = arith.constant 5.120000e+02 : f32
    %116 = vector.broadcast %cst_92 : f32 to vector<1x8xf32>
    %117 = arith.mulf %116, %115 : vector<1x8xf32>
    %118 = arith.mulf %117, %115 : vector<1x8xf32>
    %119 = arith.subf %113, %118 : vector<1x8xf32>
    %cst_93 = arith.constant 0.00195694715 : f32
    %120 = vector.broadcast %cst_93 : f32 to vector<1x8xf32>
    %121 = arith.mulf %119, %120 : vector<1x8xf32>
    %cst_94 = arith.constant 9.99999997E-7 : f32
    %122 = vector.broadcast %cst_94 : f32 to vector<1x8xf32>
    %123 = arith.maximumf %121, %122 : vector<1x8xf32>
    %124 = math.rsqrt %123 : vector<1x8xf32>
    %125 = vector.broadcast %105 : f32 to vector<1x8xf32>
    %126 = arith.mulf %125, %124 : vector<1x8xf32>
    %127 = arith.mulf %115, %126 : vector<1x8xf32>
    %128 = vector.broadcast %106 : f32 to vector<1x8xf32>
    %129 = arith.subf %128, %127 : vector<1x8xf32>
    %cst_95 = arith.constant dense<0.000000e+00> : vector<1x128xf32>
    %130 = tpu.matmul %126, %104, %cst_95 {dimension_numbers = #tpu.dot_dimension_numbers<[1], [0], [0], [1], [0, 0, 1, 1], [], []>} : vector<1x8xf32>, vector<8x128xf32>, vector<1x128xf32> -> vector<1x128xf32>
    %cst_96 = arith.constant dense<0.000000e+00> : vector<1x128xf32>
    %131 = tpu.matmul %129, %104, %cst_96 {dimension_numbers = #tpu.dot_dimension_numbers<[1], [0], [0], [1], [0, 0, 1, 1], [], []>} : vector<1x8xf32>, vector<8x128xf32>, vector<1x128xf32> -> vector<1x128xf32>
    %132 = vector.broadcast %130 : vector<1x128xf32> to vector<32x128xf32>
    %133 = arith.mulf %102, %132 : vector<32x128xf32>
    %134 = vector.broadcast %131 : vector<1x128xf32> to vector<32x128xf32>
    %135 = arith.addf %133, %134 : vector<32x128xf32>
    %136 = arith.addf %135, %41 : vector<32x128xf32>
    %cst_97 = arith.constant 0.000000e+00 : f32
    %137 = vector.broadcast %cst_97 : f32 to vector<32x128xf32>
    %138 = arith.maximumf %136, %137 : vector<32x128xf32>
    %139 = vector.extract_strided_slice %138 {offsets = [0, 0], sizes = [32, 16], strides = [1, 1]} : vector<32x128xf32> to vector<32x16xf32>
    %140 = vector.shape_cast %139 : vector<32x16xf32> to vector<2x16x16xf32>
    %c0_98 = arith.constant 0 : index
    %c0_99 = arith.constant 0 : index
    %c0_100 = arith.constant 0 : index
    %c0_101 = arith.constant 0 : index
    %141 = vector.load %arg9[%c0_98, %c0_99, %c0_100, %c0_101] : memref<2x8x16x16xf32, #tpu.memory_space<vmem>>, vector<2x1x16x16xf32>
    %142 = vector.shape_cast %141 : vector<2x1x16x16xf32> to vector<2x16x16xf32>
    %143 = vector.shape_cast %140 : vector<2x16x16xf32> to vector<2x1x16x16xf32>
    tpu.vector_store %arg9[%c0_98, %c0_99, %c0_100, %c0_101], %143 {strides = array<i32>} : memref<2x8x16x16xf32, #tpu.memory_space<vmem>>, vector<2x1x16x16xf32>,
    %144 = vector.extract_strided_slice %138 {offsets = [0, 16], sizes = [32, 16], strides = [1, 1]} : vector<32x128xf32> to vector<32x16xf32>
    %145 = vector.shape_cast %144 : vector<32x16xf32> to vector<2x16x16xf32>
    %c0_102 = arith.constant 0 : index
    %c1_103 = arith.constant 1 : index
    %c0_104 = arith.constant 0 : index
    %c0_105 = arith.constant 0 : index
    %146 = vector.load %arg9[%c0_102, %c1_103, %c0_104, %c0_105] : memref<2x8x16x16xf32, #tpu.memory_space<vmem>>, vector<2x1x16x16xf32>
    %147 = vector.shape_cast %146 : vector<2x1x16x16xf32> to vector<2x16x16xf32>
    %148 = vector.shape_cast %145 : vector<2x16x16xf32> to vector<2x1x16x16xf32>
    tpu.vector_store %arg9[%c0_102, %c1_103, %c0_104, %c0_105], %148 {strides = array<i32>} : memref<2x8x16x16xf32, #tpu.memory_space<vmem>>, vector<2x1x16x16xf32>,
    %149 = vector.extract_strided_slice %138 {offsets = [0, 32], sizes = [32, 16], strides = [1, 1]} : vector<32x128xf32> to vector<32x16xf32>
    %150 = vector.shape_cast %149 : vector<32x16xf32> to vector<2x16x16xf32>
    %c0_106 = arith.constant 0 : index
    %c2_107 = arith.constant 2 : index
    %c0_108 = arith.constant 0 : index
    %c0_109 = arith.constant 0 : index
    %151 = vector.load %arg9[%c0_106, %c2_107, %c0_108, %c0_109] : memref<2x8x16x16xf32, #tpu.memory_space<vmem>>, vector<2x1x16x16xf32>
    %152 = vector.shape_cast %151 : vector<2x1x16x16xf32> to vector<2x16x16xf32>
    %153 = vector.shape_cast %150 : vector<2x16x16xf32> to vector<2x1x16x16xf32>
    tpu.vector_store %arg9[%c0_106, %c2_107, %c0_108, %c0_109], %153 {strides = array<i32>} : memref<2x8x16x16xf32, #tpu.memory_space<vmem>>, vector<2x1x16x16xf32>,
    %154 = vector.extract_strided_slice %138 {offsets = [0, 48], sizes = [32, 16], strides = [1, 1]} : vector<32x128xf32> to vector<32x16xf32>
    %155 = vector.shape_cast %154 : vector<32x16xf32> to vector<2x16x16xf32>
    %c0_110 = arith.constant 0 : index
    %c3_111 = arith.constant 3 : index
    %c0_112 = arith.constant 0 : index
    %c0_113 = arith.constant 0 : index
    %156 = vector.load %arg9[%c0_110, %c3_111, %c0_112, %c0_113] : memref<2x8x16x16xf32, #tpu.memory_space<vmem>>, vector<2x1x16x16xf32>
    %157 = vector.shape_cast %156 : vector<2x1x16x16xf32> to vector<2x16x16xf32>
    %158 = vector.shape_cast %155 : vector<2x16x16xf32> to vector<2x1x16x16xf32>
    tpu.vector_store %arg9[%c0_110, %c3_111, %c0_112, %c0_113], %158 {strides = array<i32>} : memref<2x8x16x16xf32, #tpu.memory_space<vmem>>, vector<2x1x16x16xf32>,
    %159 = vector.extract_strided_slice %138 {offsets = [0, 64], sizes = [32, 16], strides = [1, 1]} : vector<32x128xf32> to vector<32x16xf32>
    %160 = vector.shape_cast %159 : vector<32x16xf32> to vector<2x16x16xf32>
    %c0_114 = arith.constant 0 : index
    %c4 = arith.constant 4 : index
    %c0_115 = arith.constant 0 : index
    %c0_116 = arith.constant 0 : index
    %161 = vector.load %arg9[%c0_114, %c4, %c0_115, %c0_116] : memref<2x8x16x16xf32, #tpu.memory_space<vmem>>, vector<2x1x16x16xf32>
    %162 = vector.shape_cast %161 : vector<2x1x16x16xf32> to vector<2x16x16xf32>
    %163 = vector.shape_cast %160 : vector<2x16x16xf32> to vector<2x1x16x16xf32>
    tpu.vector_store %arg9[%c0_114, %c4, %c0_115, %c0_116], %163 {strides = array<i32>} : memref<2x8x16x16xf32, #tpu.memory_space<vmem>>, vector<2x1x16x16xf32>,
    %164 = vector.extract_strided_slice %138 {offsets = [0, 80], sizes = [32, 16], strides = [1, 1]} : vector<32x128xf32> to vector<32x16xf32>
    %165 = vector.shape_cast %164 : vector<32x16xf32> to vector<2x16x16xf32>
    %c0_117 = arith.constant 0 : index
    %c5 = arith.constant 5 : index
    %c0_118 = arith.constant 0 : index
    %c0_119 = arith.constant 0 : index
    %166 = vector.load %arg9[%c0_117, %c5, %c0_118, %c0_119] : memref<2x8x16x16xf32, #tpu.memory_space<vmem>>, vector<2x1x16x16xf32>
    %167 = vector.shape_cast %166 : vector<2x1x16x16xf32> to vector<2x16x16xf32>
    %168 = vector.shape_cast %165 : vector<2x16x16xf32> to vector<2x1x16x16xf32>
    tpu.vector_store %arg9[%c0_117, %c5, %c0_118, %c0_119], %168 {strides = array<i32>} : memref<2x8x16x16xf32, #tpu.memory_space<vmem>>, vector<2x1x16x16xf32>,
    %169 = vector.extract_strided_slice %138 {offsets = [0, 96], sizes = [32, 16], strides = [1, 1]} : vector<32x128xf32> to vector<32x16xf32>
    %170 = vector.shape_cast %169 : vector<32x16xf32> to vector<2x16x16xf32>
    %c0_120 = arith.constant 0 : index
    %c6 = arith.constant 6 : index
    %c0_121 = arith.constant 0 : index
    %c0_122 = arith.constant 0 : index
    %171 = vector.load %arg9[%c0_120, %c6, %c0_121, %c0_122] : memref<2x8x16x16xf32, #tpu.memory_space<vmem>>, vector<2x1x16x16xf32>
    %172 = vector.shape_cast %171 : vector<2x1x16x16xf32> to vector<2x16x16xf32>
    %173 = vector.shape_cast %170 : vector<2x16x16xf32> to vector<2x1x16x16xf32>
    tpu.vector_store %arg9[%c0_120, %c6, %c0_121, %c0_122], %173 {strides = array<i32>} : memref<2x8x16x16xf32, #tpu.memory_space<vmem>>, vector<2x1x16x16xf32>,
    %174 = vector.extract_strided_slice %138 {offsets = [0, 112], sizes = [32, 16], strides = [1, 1]} : vector<32x128xf32> to vector<32x16xf32>
    %175 = vector.shape_cast %174 : vector<32x16xf32> to vector<2x16x16xf32>
    %c0_123 = arith.constant 0 : index
    %c7 = arith.constant 7 : index
    %c0_124 = arith.constant 0 : index
    %c0_125 = arith.constant 0 : index
    %176 = vector.load %arg9[%c0_123, %c7, %c0_124, %c0_125] : memref<2x8x16x16xf32, #tpu.memory_space<vmem>>, vector<2x1x16x16xf32>
    %177 = vector.shape_cast %176 : vector<2x1x16x16xf32> to vector<2x16x16xf32>
    %178 = vector.shape_cast %175 : vector<2x16x16xf32> to vector<2x1x16x16xf32>
    tpu.vector_store %arg9[%c0_123, %c7, %c0_124, %c0_125], %178 {strides = array<i32>} : memref<2x8x16x16xf32, #tpu.memory_space<vmem>>, vector<2x1x16x16xf32>,
    return
  }
}

</mosaic_0001>

<bundles_post_ra>
// kernel: tpu_custom_call.1
= control target key start
LH: loop header
LB: loop body
LE: loop exit
PB: predicated region body
PF: predicated region fallthrough
CT: control target
= control target key end

     0   :  { %14 = vsyncpa [#allocation5], 0  ;;  %s3145_s0 = inlined_call_operand.hbm [shape: f32[2,4,16,16], index: 0, kind: input, shape index: {}]   ;;  %s3146_s1 = inlined_call_operand.vmem [shape: bf16[3,72,256], index: 1, kind: input, shape index: {}]   ;;  %s3147_s2 = inlined_call_operand.hbm [shape: bf16[3,144,128], index: 2, kind: input, shape index: {}]   ;;  %s3148_s3 = inlined_call_operand.vmem [shape: f32[1,128], index: 3, kind: input, shape index: {}]   ;;  %s3149_s4 = inlined_call_operand.vmem [shape: f32[128,8], index: 4, kind: input, shape index: {}]   ;;  %s3150_s5 = inlined_call_operand.vmem [shape: f32[8,128], index: 5, kind: input, shape index: {}]   ;;  %s3151_s6 = inlined_call_operand.vmem [shape: f32[128,8], index: 6, kind: input, shape index: {}]   ;;  %s3152_s7 = inlined_call_operand.vmem [shape: f32[8,128], index: 7, kind: input, shape index: {}]   ;;  %s3153_s8 = inlined_call_operand.vmem [shape: f32[4], index: 8, kind: input, shape index: {}]   ;;  %s3154_s9 = inlined_call_operand.hbm [shape: f32[2,8,16,16], index: 9, kind: output, shape index: {}]  }
   0x1   :  { %15 = vsyncpa [#allocation9], 0 }
   0x2   :  { %16 = vsyncpa [#allocation7], 0 }
   0x3   :  { %17 = vsyncpa [#allocation6], 0  ;;  %s2517_s30 = smov [#allocation4]  }
   0x4   :  { %s23_s10 = sshll.u32 %s2517_s30, 4  ;;  %s24_s10 = int_to_ptr.vmem [resolvable:$true] %s23_s10 }
   0x5   :  { %s2445_s11 = scalar_lea.vmem %s24_s10, 2048  ;;  %p2450_p1 = scmp.lt.s32.totalorder %s24_s10, %s24_s10 }
   0x6   :  { %p2446_p0 = scmp.ne.s32.totalorder %s24_s10, %s2445_s11  ;;  %p2451_p2 = scmp.lt.s32.totalorder %s2445_s11, %s2445_s11 }
   0x8   :  { %p2452_p3 = por %p2451_p2, %p2450_p1 }
   0xa   :  { %p2453_p4 = pnand %p2452_p3, %p2446_p0 }
   0xc   :  { %2456 = shalt.err (!%p2453_p4)
}
   0xd   :  { %s2518_s12 = smov 128   ;;  %s2519_s13 = smov 8  }
   0xe   :  { %29 = dma.hbm_to_vmem [thread:$0]  %s3145_s0, 2048, %s24_s10, [#allocation5], %s2518_s12, %s2518_s12, %s2519_s13  }
   0xf   :  { %s2520_s16 = smov [#allocation8]  }
  0x10   :  { %s37_s17 = sshll.u32 %s2520_s16, 4  ;;  %s38_s17 = int_to_ptr.vmem [resolvable:$true] %s37_s17 }
  0x11   :  { %s2465_s18 = scalar_lea.vmem %s38_s17, 3456  ;;  %p2470_p6 = scmp.lt.s32.totalorder %s38_s17, %s38_s17 }
  0x12   :  { %p2466_p5 = scmp.ne.s32.totalorder %s38_s17, %s2465_s18  ;;  %p2471_p7 = scmp.lt.s32.totalorder %s2465_s18, %s2465_s18 }
  0x14   :  { %p2472_p8 = por %p2471_p7, %p2470_p6 }
  0x16   :  { %p2473_p9 = pnand %p2472_p8, %p2466_p5 }
  0x18   :  { %2476 = shalt.err (!%p2473_p9)
}
  0x19   :  { %s2521_s19 = smov 64   ;;  %s2522_s20 = smov 4  }
  0x1a   :  { %43 = dma.hbm_to_vmem [thread:$0]  %s3147_s2, 3456, %s38_s17, [#allocation9], %s2521_s19, %s2521_s19, %s2522_s20  }
  0x1b   :  { %s60_s24 = sshll.u32 %s3153_s8, 4  ;;  %s61_s24 = int_to_ptr.vmem [resolvable:$true] %s60_s24 }
  0x1c   :  { %s2477_s25 = scalar_lea.vmem %s61_s24, 16  ;;  %p2482_p11 = scmp.lt.s32.totalorder %s61_s24, %s61_s24 }
  0x1d   :  { %p2478_p10 = scmp.ne.s32.totalorder %s61_s24, %s2477_s25  ;;  %p2483_p12 = scmp.lt.s32.totalorder %s2477_s25, %s2477_s25 }
  0x1f   :  { %p2484_p13 = por %p2483_p12, %p2482_p11 }
  0x21   :  { %p2485_p0 = pnand %p2484_p13, %p2478_p10 }
  0x23   :  { %2488 = shalt.err (!%p2485_p0)
}
  0x24   :  { %s2523_s26 = smov [#allocation10]  }
  0x25   :  { %63 = dma.vmem_to_smem %s61_s24, 16, %s2523_s26, [#allocation7]  }
  0x26   :  { %2509 = dma.done.wait [#allocation5], 2048  }
  0x27   :  { %2510 = vsyncadd [#allocation5], 4294965248 }
  0x28   :  { %2511 = dma.done.wait [#allocation9], 3456  }
  0x29   :  { %2512 = vsyncadd [#allocation9], 4294963840 }
  0x2a   :  { %2513 = dma.done.wait [#allocation7], 16  }
  0x2b   :  { %2514 = vsyncadd [#allocation7], 4294967280 }
  0x2c   :  { %73 = sfence }
  0x2d   :  { %v85_v0 = vld [vmem:[#allocation4 + $0x10] sm:$0xff]  ;;  %v83_v1 = vld [vmem:[#allocation4] sm:$0xff]  ;;  %s2524_s2 = smov 19   ;;  %s2525_s8 = smov 1   ;;  %vm75_vm0 = vcmask 588800   ;;  %v86_v2 = vld [vmem:[#allocation4 + $0x18] sm:$0xff] }
  0x2e   :  { %124 = vrot.lane.b32.xlu1 %v85_v0, %s2524_s2  ;;  %103 = vrot.lane.b32.xlu0 %v83_v1, %s2525_s8  ;;  %v84_v3 = vld [vmem:[#allocation4 + $0x8] sm:$0xff]  ;;  %vm78_vm1 = vcmask 582656   ;;  %v2526_v4 = vmov 0.0   ;;  %v87_v6 = vld [vmem:[#allocation4 + $0x20] sm:$0xff]  ;;  %v2018_v7 = vld [vmem:[%s3146_s1 + $0x88] sm:$0xff]  ;;  %vm265_vm2 = vcmask 1043456  }
  0x2f   :  { %76 = vst.msk [vmem:[#allocation2] sm:$0xff] %vm75_vm0, %v2526_v4  ;;  %77 = vst.msk [vmem:[#allocation2 + $0x8] sm:$0xff] %vm75_vm0, %v2526_v4  ;;  %v88_v5 = vld [vmem:[#allocation4 + $0x28] sm:$0xff]  ;;  %v197_v8 = vld [vmem:[%s3146_s1 + $0x40] sm:$0xff]  ;;  %v2028_v9 = vcombine.high %v2018_v7, %v2018_v7  ;;  %v2027_v11 = vcombine.low %v2018_v7, %v2018_v7  ;;  %s2527_s18 = smov 37   ;;  %v2528_v25 = vmov 0  }
  0x30   :  { %80 = vst.msk [vmem:[#allocation2 + $0x18] sm:$0xff] %vm75_vm0, %v2526_v4  ;;  %81 = vst.msk [vmem:[#allocation2 + $0x20] sm:$0xff] %vm75_vm0, %v2526_v4  ;;  %v2041_v10 = vcombine.high %v197_v8, %v197_v8  ;;  %v2040_v12 = vcombine.low %v197_v8, %v197_v8  ;;  %v2369_v13 = vld [vmem:[%s3146_s1 + $0x7c] ss:$8 sps:$4 sm:$0xff]   ;;  %v90_v15 = vld [vmem:[#allocation4 + $0x38] sm:$0xff]  ;;  %304 = vmatprep.mubr.bf16.mxu0 %v2528_v25  ;;  %414 = vmatprep.mubr.bf16.mxu1 %v2528_v25  ;;  %s2529_s25 = smov 55  }
  0x31   :  { %940 = vst [vmem:[#allocation3] sm:$0xff] %v2526_v4  ;;  %943 = vst [vmem:[#allocation3 + $0x10] sm:$0xff] %v2526_v4  ;;  %v2371_v14 = vld [vmem:[%s3146_s1 + $0x34] ss:$8 sps:$4 sm:$0xff]   ;;  %v89_v16 = vld [vmem:[#allocation4 + $0x30] sm:$0xff]  ;;  %2029 = vmatprep.subr.msk.bf16.mxu0 %vm265_vm2, %v2028_v9  ;;  %v267_v17 = vsel %vm265_vm2, %v2027_v11, 0 }
  0x32   :  { %945 = vst [vmem:[#allocation3 + $0x20] sm:$0x3] %v2526_v4  ;;  %948 = vst [vmem:[#allocation3 + $0x30] sm:$0xff] %v2526_v4  ;;  %126 = vrot.lane.b32.xlu1 %v86_v2, %s2524_s2  ;;  %105 = vrot.lane.b32.xlu0 %v84_v3, %s2525_s8  ;;  %v377_v18 = vsel %vm265_vm2, %v2040_v12, 0  ;;  %v2373_v19 = vld [vmem:[%s3146_s1 + $0x78] ss:$8 sps:$4 sm:$0xff]  }
  0x33   :  { %950 = vst [vmem:[#allocation3 + $0x40] sm:$0xff] %v2526_v4  ;;  %952 = vst [vmem:[#allocation3 + $0x50] sm:$0x3] %v2526_v4  ;;  %2042 = vmatprep.subr.msk.bf16.mxu1 %vm265_vm2, %v2041_v10  ;;  %279 = vmatpush1.bf16.msra.mxu0 %v267_v17  ;;  %v2374_v20 = vld [vmem:[%s3146_s1 + $0x30] ss:$8 sps:$4 sm:$0xff]   ;;  %v94_v30 = vld [vmem:[#allocation4 + $0x58] sm:$0xff] }
  0x34   :  { %79 = vst.msk [vmem:[#allocation2 + $0x10] sm:$0x3] %vm78_vm1, %v2526_v4  ;;  %82 = vst.msk [vmem:[#allocation2 + $0x28] sm:$0x3] %vm78_vm1, %v2526_v4  ;;  %389 = vmatpush1.bf16.msra.mxu1 %v377_v18  ;;  %280 = vmatprep.subr.bf16.mxu0 %v2369_v13  ;;  %v2375_v21 = vld [vmem:[%s3146_s1 + $0x6c] ss:$8 sps:$4 sm:$0xff]  }
  0x35   :  { %390 = vmatprep.subr.bf16.mxu1 %v2371_v14  ;;  %v2377_v22 = vld [vmem:[%s3146_s1 + $0x24] ss:$8 sps:$4 sm:$0xff]   ;;  %v92_v23 = vld [vmem:[#allocation4 + $0x48] sm:$0xff]  ;;  %v91_v24 = vld [vmem:[#allocation4 + $0x40] sm:$0xff]  ;;  %vm115_vm3 = vcmask 138248   ;;  %vm136_vm4 = vcmask 285848  }
  0x36   :  { %147 = vrot.lane.b32.xlu1 %v88_v5, %s2527_s18  ;;  %145 = vrot.lane.b32.xlu0 %v87_v6, %s2527_s18  ;;  %v2379_v26 = vld [vmem:[%s3146_s1 + $0x68] ss:$8 sps:$4 sm:$0xff]   ;;  %v2381_v28 = vld [vmem:[%s3146_s1 + $0x5c] ss:$8 sps:$4 sm:$0xff]   ;;  %vm157_vm5 = vcmask 433448   ;;  %vm178_vm6 = vcmask 581048  }
  0x37   :  { %281 = vmatpush1.bf16.msra.mxu0 %v2373_v19  ;;  %v2380_v27 = vld [vmem:[%s3146_s1 + $0x20] ss:$8 sps:$4 sm:$0xff]   ;;  %v2383_v29 = vld [vmem:[%s3146_s1 + $0x14] ss:$8 sps:$4 sm:$0xff]   ;;  %v2386_v33 = vld [vmem:[%s3146_s1 + $0x10] ss:$8 sps:$4 sm:$0xff]  }
  0x38   :  { %391 = vmatpush1.bf16.msra.mxu1 %v2374_v20  ;;  %282 = vmatprep.subr.bf16.mxu0 %v2375_v21  ;;  %v93_v31 = vld [vmem:[#allocation4 + $0x50] sm:$0xff]  ;;  %v2053_v34 = vld [vmem:[%s3146_s1 + $0xd0] sm:$0xff]  ;;  %v96_v38 = vld [vmem:[#allocation4 + $0x68] sm:$0xff]  ;;  %vm2530_vm7 = vmmov 0   ;;  %s597_s11 = sld [smem:[#allocation10]]  ;;  %vm773_vm8 = vcmask 64512  }
  0x39   :  { %392 = vmatprep.subr.bf16.mxu1 %v2377_v22  ;;  %v2385_v32 = vld [vmem:[%s3146_s1 + $0x58] ss:$8 sps:$4 sm:$0xff]   ;;  %v2387_v35 = vld [vmem:[%s3146_s1 + $0x4c] ss:$8 sps:$4 sm:$0xff]   ;;  %v2062_v37 = vcombine.low %v2053_v34, %v2053_v34  ;;  %v2391_v40 = vld [vmem:[%s3146_s1 + $0x48] ss:$8 sps:$4 sm:$0xff]   ;;  %v2063_v43 = vcombine.high %v2053_v34, %v2053_v34 }
  0x3a   :  { %168 = vrot.lane.b32.xlu1 %v90_v15, %s2529_s25  ;;  %166 = vrot.lane.b32.xlu0 %v89_v16, %s2529_s25  ;;  %v2389_v36 = vld [vmem:[%s3146_s1 + $0x4] ss:$8 sps:$4 sm:$0xff]   ;;  %v95_v39 = vld [vmem:[#allocation4 + $0x60] sm:$0xff]  ;;  %v2392_v41 = vld [vmem:[%s3146_s1] ss:$8 sps:$4 sm:$0xff]   ;;  %vm941_vm9 = vcmask 130048  }
  0x3b   :  { %283 = vmatpush1.bf16.msra.mxu0 %v2379_v26  ;;  %v503_v42 = vsel %vm265_vm2, %v2062_v37, 0  ;;  %v98_v44 = vld [vmem:[#allocation4 + $0x78] sm:$0xff]  ;;  %v97_v45 = vld [vmem:[#allocation4 + $0x70] sm:$0xff]  ;;  %v2399_v5 = vld [vmem:[%s3146_s1 + $0xb4] ss:$8 sps:$4 sm:$0xff]   ;;  %942 = vst.msk [vmem:[#allocation3 + $0x8] sm:$0xff] %vm941_vm9, %v2526_v4 }
  0x3c   :  { %393 = vmatpush1.bf16.msra.mxu1 %v2380_v27  ;;  %284 = vmatprep.subr.bf16.mxu0 %v2381_v28  ;;  %v2396_v63 = vld [vmem:[%s3146_s1 + $0xc4] ss:$8 sps:$4 sm:$0xff]   ;;  %v2394_v3 = vld [vmem:[%s3146_s1 + $0xc0] ss:$8 sps:$4 sm:$0xff]   ;;  %v2397_v8 = vld [vmem:[%s3146_s1 + $0xb0] ss:$8 sps:$4 sm:$0xff]  }
  0x3d   :  { %394 = vmatprep.subr.bf16.mxu1 %v2383_v29  ;;  %v2402_v9 = vld [vmem:[%s3146_s1 + $0xa4] ss:$8 sps:$4 sm:$0xff]   ;;  %v2400_v10 = vld [vmem:[%s3146_s1 + $0xa0] ss:$8 sps:$4 sm:$0xff]   ;;  %v2405_v11 = vld [vmem:[%s3146_s1 + $0x94] ss:$8 sps:$4 sm:$0xff]  }
  0x3e   :  { %109 = vrot.lane.b32.xlu1 %v92_v23, %s2525_s8  ;;  %107 = vrot.lane.b32.xlu0 %v91_v24, %s2525_s8  ;;  %v2403_v12 = vld [vmem:[%s3146_s1 + $0x90] ss:$8 sps:$4 sm:$0xff]   ;;  %v593_v28 = vld [vmem:[%s3149_s4 + $0x68] sm:$0xff]  ;;  %944 = vst.msk [vmem:[#allocation3 + $0x18] sm:$0xff] %vm941_vm9, %v2526_v4  ;;  %949 = vst.msk [vmem:[#allocation3 + $0x38] sm:$0xff] %vm941_vm9, %v2526_v4  ;;  %vm946_vm10 = vcmask 123904  }
  0x3f   :  { %285 = vmatpush1.bf16.msra.mxu0 %v2385_v32  ;;  %v595_v26 = vld [vmem:[%s3149_s4 + $0x78] sm:$0xff]  ;;  %v594_v27 = vld [vmem:[%s3149_s4 + $0x70] sm:$0xff]  ;;  %v592_v29 = vld [vmem:[%s3149_s4 + $0x60] sm:$0xff]  ;;  %951 = vst.msk [vmem:[#allocation3 + $0x48] sm:$0xff] %vm941_vm9, %v2526_v4  ;;  %vm958_vm11 = vcmask 1040384   ;;  %vm983_vm12 = vcmask 1047617  }
  0x40   :  { %395 = vmatpush1.bf16.msra.mxu1 %v2386_v33  ;;  %286 = vmatprep.subr.bf16.mxu0 %v2387_v35  ;;  %v589_v32 = vld [vmem:[%s3149_s4 + $0x48] sm:$0xff]  ;;  %v588_v33 = vld [vmem:[%s3149_s4 + $0x40] sm:$0xff]  ;;  %v587_v34 = vld [vmem:[%s3149_s4 + $0x38] sm:$0xff]  ;;  %947 = vst.msk [vmem:[#allocation3 + $0x28] sm:$0x3] %vm946_vm10, %v2526_v4  ;;  %vm985_vm13 = vcmask 64513  }
  0x41   :  { %396 = vmatprep.subr.bf16.mxu1 %v2389_v36  ;;  %v586_v35 = vld [vmem:[%s3149_s4 + $0x30] sm:$0xff]  ;;  %v585_v36 = vld [vmem:[%s3149_s4 + $0x28] sm:$0xff]  ;;  %v584_v37 = vld [vmem:[%s3149_s4 + $0x20] sm:$0xff]  ;;  %953 = vst.msk [vmem:[#allocation3 + $0x58] sm:$0x3] %vm946_vm10, %v2526_v4  ;;  %vm987_vm14 = vcmask 1047616  }
  0x42   :  { %130 = vrot.lane.b32.xlu1 %v94_v30, %s2524_s2  ;;  %128 = vrot.lane.b32.xlu0 %v93_v31, %s2524_s2  ;;  %v591_v30 = vld [vmem:[%s3149_s4 + $0x58] sm:$0xff]  ;;  %v590_v31 = vld [vmem:[%s3149_s4 + $0x50] sm:$0xff]  ;;  %vm990_vm15 = vcmask 1040448   ;;  %vm1050_vm1 = vcmask 1046528   ;;  %s2104_s8 = sld [smem:[#allocation10 + $0x2]]  ;;  %s2532_s26 = smov 96  }
  0x43   :  { %287 = vmatpush1.bf16.msra.mxu0 %v2391_v40  ;;  %v581_v40 = vld [vmem:[%s3149_s4 + $0x8] sm:$0xff]  ;;  %s2105_s1 = sld [smem:[#allocation10 + $0x3]]  ;;  %s2533_s27 = smov 80  }
  0x44   :  { %397 = vmatpush1.bf16.msra.mxu1 %v2392_v41  ;;  %2064 = vmatprep.subr.msk.bf16.mxu0 %vm265_vm2, %v2063_v43  ;;  %v580_v41 = vld [vmem:[%s3149_s4] sm:$0xff]  ;;  %vm1336_vm2 = vcmask 1045504   ;;  %s2534_s28 = smov 48   ;;  %s2535_s29 = smov 32  }
  0x45   :  { %2184 = vmatprep.subr.mxu1 %v2526_v4  ;;  %s2536_s2 = smov 16  }
  0x46   :  { %151 = vrot.lane.b32.xlu1 %v96_v38, %s2527_s18  ;;  %149 = vrot.lane.b32.xlu0 %v95_v39, %s2527_s18  ;;  %v583_v38 = vld [vmem:[%s3149_s4 + $0x18] sm:$0xff]  ;;  %v582_v39 = vld [vmem:[%s3149_s4 + $0x10] sm:$0xff] }
  0x4a   :  { %172 = vrot.lane.b32.xlu1 %v98_v44, %s2529_s25  ;;  %170 = vrot.lane.b32.xlu0 %v97_v45, %s2529_s25 }
  0xa0   :  { %v125_v46 = vpop.permute.xlu1 %124  ;;  %v104_v47 = vpop.permute.xlu0 %103 }
  0xa1   :  { %116 = vst.msk [vmem:[#allocation2 + $0x1] sm:$0xff] %vm115_vm3, %v104_v47 }
  0xa2   :  { %137 = vst.msk [vmem:[#allocation2 + $0x1] sm:$0xff] %vm136_vm4, %v125_v46 }
  0xa4   :  { %v127_v48 = vpop.permute.xlu1 %126  ;;  %v106_v49 = vpop.permute.xlu0 %105 }
  0xa5   :  { %117 = vst.msk [vmem:[#allocation2 + $0x9] sm:$0xff] %vm115_vm3, %v106_v49 }
  0xa6   :  { %138 = vst.msk [vmem:[#allocation2 + $0x9] sm:$0xff] %vm136_vm4, %v127_v48 }
  0xa8   :  { %v148_v50 = vpop.permute.xlu1 %147  ;;  %v146_v51 = vpop.permute.xlu0 %145 }
  0xa9   :  { %159 = vst.msk [vmem:[#allocation2 + $0x9] sm:$0xff] %vm157_vm5, %v148_v50  ;;  %158 = vst.msk [vmem:[#allocation2 + $0x1] sm:$0xff] %vm157_vm5, %v146_v51 }
  0xac   :  { %v169_v52 = vpop.permute.xlu1 %168  ;;  %v167_v53 = vpop.permute.xlu0 %166 }
  0xad   :  { %180 = vst.msk [vmem:[#allocation2 + $0x9] sm:$0xff] %vm178_vm6, %v169_v52  ;;  %179 = vst.msk [vmem:[#allocation2 + $0x1] sm:$0xff] %vm178_vm6, %v167_v53 }
  0xb0   :  { %v110_v54 = vpop.permute.xlu1 %109  ;;  %v108_v55 = vpop.permute.xlu0 %107 }
  0xb1   :  { %119 = vst.msk [vmem:[#allocation2 + $0x21] sm:$0xff] %vm115_vm3, %v110_v54  ;;  %118 = vst.msk [vmem:[#allocation2 + $0x19] sm:$0xff] %vm115_vm3, %v108_v55 }
  0xb4   :  { %v131_v56 = vpop.permute.xlu1 %130  ;;  %v129_v57 = vpop.permute.xlu0 %128  ;;  %v198_v58 = vld [vmem:[#allocation2 + $0x1] sm:$0xff]  ;;  %v199_v59 = vld [vmem:[#allocation2 + $0x9] sm:$0xff] }
  0xb5   :  { %v183_v60 = vld [vmem:[#allocation2] sm:$0xff]  ;;  %140 = vst.msk [vmem:[#allocation2 + $0x21] sm:$0xff] %vm136_vm4, %v131_v56  ;;  %139 = vst.msk [vmem:[#allocation2 + $0x19] sm:$0xff] %vm136_vm4, %v129_v57  ;;  %v202_v61 = vpack.c.bf16 %v199_v59, %v198_v58  ;;  %v184_v62 = vld [vmem:[#allocation2 + $0x8] sm:$0xff] }
  0xb6   :  { %v187_v0 = vpack.c.bf16 %v184_v62, %v183_v60  ;;  %v435_v19 = vld [vmem:[#allocation2 + $0x2] sm:$0xff]  ;;  %v436_v20 = vld [vmem:[#allocation2 + $0xa] sm:$0xff] }
  0xb7   :  { %2030 = vmatmul.mubr.msk.bf16.vlgmr.msra.gmra.mxu0 %vm75_vm0, %v202_v61  ;;  %v439_v21 = vpack.c.bf16 %v436_v20, %v435_v19 }
  0xb8   :  { %2043 = vmatmul.mubr.msk.bf16.vlgmr.msra.gmra.mxu1 %vm75_vm0, %v187_v0  ;;  %v152_v1 = vpop.permute.xlu1 %151  ;;  %v150_v2 = vpop.permute.xlu0 %149  ;;  %515 = vmatpush1.bf16.msra.mxu0 %v503_v42 }
  0xb9   :  { %161 = vst.msk [vmem:[#allocation2 + $0x21] sm:$0xff] %vm157_vm5, %v152_v1  ;;  %160 = vst.msk [vmem:[#allocation2 + $0x19] sm:$0xff] %vm157_vm5, %v150_v2  ;;  %516 = vmatprep.subr.bf16.mxu0 %v2396_v63  ;;  %314 = vmatprep.mubr.bf16.mxu0 %v2528_v25 }
  0xba   :  { %424 = vmatprep.mubr.bf16.mxu1 %v2528_v25  ;;  %2185 = vmatpush3.msra.mxu1 %v595_v26 }
  0xbb   :  { %2186 = vmatprep.subr.mxu1 %v2526_v4 }
  0xbc   :  { %v173_v6 = vpop.permute.xlu1 %172  ;;  %v171_v7 = vpop.permute.xlu0 %170  ;;  %517 = vmatpush1.bf16.msra.mxu0 %v2394_v3  ;;  %2187 = vmatpush3.msra.mxu1 %v594_v27 }
  0xbd   :  { %182 = vst.msk [vmem:[#allocation2 + $0x21] sm:$0xff] %vm178_vm6, %v173_v6  ;;  %181 = vst.msk [vmem:[#allocation2 + $0x19] sm:$0xff] %vm178_vm6, %v171_v7  ;;  %518 = vmatprep.subr.bf16.mxu0 %v2399_v5  ;;  %2188 = vmatprep.subr.mxu1 %v2526_v4 }
  0xbe   :  { %2189 = vmatpush3.msra.mxu1 %v593_v28 }
  0xbf   :  { %2190 = vmatprep.subr.mxu1 %v2526_v4 }
  0xc0   :  { %519 = vmatpush1.bf16.msra.mxu0 %v2397_v8  ;;  %2191 = vmatpush3.msra.mxu1 %v592_v29 }
  0xc1   :  { %520 = vmatprep.subr.bf16.mxu0 %v2402_v9  ;;  %2192 = vmatprep.subr.mxu1 %v2526_v4 }
  0xc2   :  { %2193 = vmatpush3.msra.mxu1 %v591_v30 }
  0xc3   :  { %2194 = vmatprep.subr.mxu1 %v2526_v4 }
  0xc4   :  { %v200_v13 = vld [vmem:[#allocation2 + $0x19] sm:$0xff]  ;;  %v201_v14 = vld [vmem:[#allocation2 + $0x21] sm:$0xff]  ;;  %521 = vmatpush1.bf16.msra.mxu0 %v2400_v10  ;;  %2195 = vmatpush3.msra.mxu1 %v590_v31 }
  0xc5   :  { %v185_v15 = vld [vmem:[#allocation2 + $0x18] sm:$0xff]  ;;  %v203_v16 = vpack.c.bf16 %v201_v14, %v200_v13  ;;  %v186_v17 = vld [vmem:[#allocation2 + $0x20] sm:$0xff]  ;;  %522 = vmatprep.subr.bf16.mxu0 %v2405_v11  ;;  %2196 = vmatprep.subr.mxu1 %v2526_v4 }
  0xc6   :  { %v188_v18 = vpack.c.bf16 %v186_v17, %v185_v15  ;;  %v437_v22 = vld [vmem:[#allocation2 + $0x1a] sm:$0xff]  ;;  %v438_v23 = vld [vmem:[#allocation2 + $0x22] sm:$0xff]  ;;  %2197 = vmatpush3.msra.mxu1 %v589_v32 }
  0xc7   :  { %2031 = vmatmul.mubr.msk.bf16.gmra.mxu0 %vm75_vm0, %v203_v16  ;;  %v440_v24 = vpack.c.bf16 %v438_v23, %v437_v22  ;;  %2198 = vmatprep.subr.mxu1 %v2526_v4 }
  0xc8   :  { %2044 = vmatmul.mubr.msk.bf16.gmra.mxu1 %vm75_vm0, %v188_v18  ;;  %523 = vmatpush1.bf16.msra.mxu0 %v2403_v12 }
  0xc9   :  { %540 = vmatprep.mubr.bf16.mxu0 %v2528_v25  ;;  %2219 = vmatprep.subr.mxu0 %v2526_v4 }
  0xca   :  { %2199 = vmatpush3.msra.mxu1 %v588_v33  ;;  %2216 = vmatprep.mubr.msk.f32.mxu1 %vm2530_vm7, %v2526_v4 }
  0xcb   :  { %2200 = vmatprep.subr.mxu1 %v2526_v4 }
  0xcc   :  { %2201 = vmatpush3.msra.mxu1 %v587_v34 }
  0xcd   :  { %2202 = vmatprep.subr.mxu1 %v2526_v4 }
  0xce   :  { %2203 = vmatpush3.msra.mxu1 %v586_v35 }
  0xcf   :  { %2065 = vmatmul.mubr.msk.bf16.vlgmr.msra.gmra.mxu0 %vm75_vm0, %v439_v21  ;;  %2204 = vmatprep.subr.mxu1 %v2526_v4 }
  0xd0   :  { %550 = vmatprep.mubr.bf16.mxu0 %v2528_v25  ;;  %2220 = vmatpush3.msra.mxu0 %v595_v26 }
  0xd1   :  { %2221 = vmatprep.subr.mxu0 %v2526_v4  ;;  %2205 = vmatpush3.msra.mxu1 %v585_v36 }
  0xd2   :  { %2222 = vmatpush3.msra.mxu0 %v594_v27  ;;  %2206 = vmatprep.subr.mxu1 %v2526_v4 }
  0xd3   :  { %2223 = vmatprep.subr.mxu0 %v2526_v4  ;;  %2207 = vmatpush3.msra.mxu1 %v584_v37 }
  0xd4   :  { %2224 = vmatpush3.msra.mxu0 %v593_v28  ;;  %2208 = vmatprep.subr.mxu1 %v2526_v4 }
  0xd5   :  { %2225 = vmatprep.subr.mxu0 %v2526_v4  ;;  %2209 = vmatpush3.msra.mxu1 %v583_v38 }
  0xd6   :  { %2226 = vmatpush3.msra.mxu0 %v592_v29  ;;  %2210 = vmatprep.subr.mxu1 %v2526_v4 }
  0xd7   :  { %2066 = vmatmul.mubr.msk.bf16.gmra.mxu0 %vm75_vm0, %v440_v24  ;;  %2227 = vmatprep.subr.mxu0 %v2526_v4  ;;  %vm992_vm0 = vcmask 57344  }
  0xd8   :  { %2228 = vmatpush3.msra.mxu0 %v591_v30  ;;  %2211 = vmatpush3.msra.mxu1 %v582_v39 }
  0xd9   :  { %2229 = vmatprep.subr.mxu0 %v2526_v4  ;;  %2212 = vmatprep.subr.mxu1 %v2526_v4 }
  0xda   :  { %2230 = vmatpush3.msra.mxu0 %v590_v31  ;;  %2213 = vmatpush3.msra.mxu1 %v581_v40 }
  0xdb   :  { %2231 = vmatprep.subr.mxu0 %v2526_v4  ;;  %2214 = vmatprep.subr.mxu1 %v2526_v4 }
  0xdc   :  { %2232 = vmatpush3.msra.mxu0 %v589_v32  ;;  %2215 = vmatpush3.msra.mxu1 %v580_v41 }
  0xdd   :  { %2233 = vmatprep.subr.mxu0 %v2526_v4  ;;  %2251 = vmatprep.mubr.msk.f32.mxu0 %vm2530_vm7, %v2526_v4 }
  0xde   :  { %2234 = vmatpush3.msra.mxu0 %v588_v33  ;;  %1162 = vmatprep.subr.bf16.mxu1 %v2528_v25 }
  0xdf   :  { %2235 = vmatprep.subr.mxu0 %v2526_v4 }
  0xe0   :  { %2236 = vmatpush3.msra.mxu0 %v587_v34 }
  0xe1   :  { %2237 = vmatprep.subr.mxu0 %v2526_v4 }
  0xe2   :  { %2238 = vmatpush3.msra.mxu0 %v586_v35 }
  0xe3   :  { %2239 = vmatprep.subr.mxu0 %v2526_v4 }
  0xe4   :  { %2240 = vmatpush3.msra.mxu0 %v585_v36 }
  0xe5   :  { %2241 = vmatprep.subr.mxu0 %v2526_v4 }
  0xe6   :  { %2242 = vmatpush3.msra.mxu0 %v584_v37 }
  0xe7   :  { %2243 = vmatprep.subr.mxu0 %v2526_v4 }
  0xe8   :  { %2244 = vmatpush3.msra.mxu0 %v583_v38  ;;  %v596_v38 = vld [vmem:[%s3150_s5] sm:$0xff]  ;;  %s2068_s5 = sld [smem:[#allocation10 + $0x1]] }
  0xe9   :  { %2245 = vmatprep.subr.mxu0 %v2526_v4 }
  0xea   :  { %2246 = vmatpush3.msra.mxu0 %v582_v39 }
  0xeb   :  { %2247 = vmatprep.subr.mxu0 %v2526_v4 }
  0xec   :  { %2248 = vmatpush3.msra.mxu0 %v581_v40 }
  0xed   :  { %2249 = vmatprep.subr.mxu0 %v2526_v4 }
  0xee   :  { %2250 = vmatpush3.msra.mxu0 %v580_v41 }
  0xef   :  { %2254 = vmatprep.subr.mxu0 %v2526_v4 }
 0x177   :  { %v306_v42 = vpop.f32.mrf.mxu0 }
 0x178   :  { %v416_v43 = vpop.f32.mrf.mxu1 }
 0x179   :  { %v308_v44 = vpop.f32.mrf.mxu0  ;;  %v417_v0 = vadd.f32 %v416_v43, %v306_v42 }
 0x17a   :  { %v418_v45 = vpop.f32.mrf.mxu1 }
 0x17b   :  { %v419_v46 = vadd.f32 %v418_v45, %v308_v44  ;;  %v310_v47 = vpop.f32.mrf.mxu0 }
 0x17c   :  { %v420_v48 = vpop.f32.mrf.mxu1 }
 0x17d   :  { %v312_v49 = vpop.f32.mrf.mxu0  ;;  %v421_v61 = vadd.f32 %v420_v48, %v310_v47 }
 0x17e   :  { %v422_v50 = vpop.f32.mrf.mxu1 }
 0x17f   :  { %v423_v51 = vadd.f32 %v422_v50, %v312_v49 }
 0x187   :  { %v316_v52 = vpop.f32.mrf.mxu0 }
 0x188   :  { %v426_v53 = vpop.f32.mrf.mxu1 }
 0x189   :  { %v318_v54 = vpop.f32.mrf.mxu0  ;;  %v427_v3 = vadd.f32 %v426_v53, %v316_v52 }
 0x18a   :  { %v428_v55 = vpop.f32.mrf.mxu1 }
 0x18b   :  { %v429_v56 = vadd.f32 %v428_v55, %v318_v54  ;;  %v320_v57 = vpop.f32.mrf.mxu0  ;;  %v771_v54 = vstv %s2068_s5 }
 0x18c   :  { %v430_v5 = vpop.f32.mrf.mxu1 }
 0x18d   :  { %v2835_v58 = vpop.f32.mrf.mxu0  ;;  %v431_v11 = vadd.f32 %v430_v5, %v320_v57  ;;  %v2406_v57 = vld [vmem:[#allocation8 + $0x38] sm:$0xff]  }
 0x18e   :  { %v2869_v39 = vpop.f32.mrf.mxu1  ;;  %v2413_v5 = vld [vmem:[#allocation8 + $0x18] sm:$0xff]  }
 0x18f   :  { %v542_v59 = vpop.f32.mrf.mxu0 }
 0x190   :  { %v2841_v6 = vadd.f32 %v542_v59, %v417_v0  ;;  %v2408_v59 = vld [vmem:[#allocation8 + $0x80] sm:$0xff]   ;;  %v2412_v0 = vld [vmem:[#allocation8 + $0x70] sm:$0xff]  }
 0x191   :  { %v544_v60 = vpop.f32.mrf.mxu0 }
 0x192   :  { %v2837_v62 = vadd.f32 %v544_v60, %v419_v46  ;;  %v608_v13 = vmul.f32 %v2841_v6, %v2841_v6  ;;  %v2407_v60 = vld [vmem:[#allocation8 + $0x30] sm:$0xff]  }
 0x193   :  { %v546_v63 = vpop.f32.mrf.mxu0 }
 0x194   :  { %v2839_v1 = vadd.f32 %v546_v63, %v421_v61  ;;  %v2410_v61 = vld [vmem:[#allocation8 + $0x78] sm:$0xff]   ;;  %v2409_v63 = vld [vmem:[#allocation8 + $0x28] sm:$0xff]  }
 0x195   :  { %v548_v2 = vpop.f32.mrf.mxu0 }
 0x196   :  { %v2843_v7 = vadd.f32 %v548_v2, %v423_v51  ;;  %v609_v9 = vmul.f32 %v2839_v1, %v2839_v1  ;;  %v599_v14 = vadd.f32 %v2839_v1, %v2841_v6  ;;  %v768_v51 = vstv %s597_s11  ;;  %v2411_v2 = vld [vmem:[#allocation8 + $0x20] sm:$0xff]  }
 0x197   :  { %v552_v8 = vpop.f32.mrf.mxu0 }
 0x198   :  { %v2847_v10 = vadd.f32 %v552_v8, %v427_v3  ;;  %v612_v18 = vadd.f32 %v609_v9, %v608_v13  ;;  %v2414_v3 = vld [vmem:[#allocation8 + $0x68] sm:$0xff]   ;;  %v2416_v8 = vld [vmem:[#allocation8 + $0x60] sm:$0xff]   ;;  %v2415_v9 = vld [vmem:[#allocation8 + $0x10] sm:$0xff]  }
 0x199   :  { %v554_v12 = vpop.f32.mrf.mxu0 }
 0x19a   :  { %v610_v15 = vmul.f32 %v2847_v10, %v2847_v10  ;;  %v2855_v16 = vadd.f32 %v554_v12, %v429_v56  ;;  %v600_v19 = vadd.f32 %v599_v14, %v2847_v10 }
 0x19b   :  { %v556_v17 = vpop.f32.mrf.mxu0 }
 0x19c   :  { %v2858_v20 = vadd.f32 %v556_v17, %v431_v11  ;;  %v613_v21 = vadd.f32 %v612_v18, %v610_v15  ;;  %v920_v11 = vlaneseq  ;;  %v2417_v15 = vld [vmem:[#allocation8 + $0x8] sm:$0xff]   ;;  %v2418_v18 = vld [vmem:[#allocation8 + $0x58] sm:$0xff]  }
 0x19d   :  { %v2871_v40 = vpop.f32.mrf.mxu0 }
 0x19e   :  { %v601_v22 = vadd.f32 %v600_v19, %v2858_v20  ;;  %v611_v23 = vmul.f32 %v2858_v20, %v2858_v20  ;;  %v921_v12 = vshrl.u32 %v920_v11, 7 }
 0x1a0   :  { %v602_v24 = vrot.slane %v601_v22, 4  ;;  %v614_v26 = vadd.f32 %v613_v21, %v611_v23  ;;  %v2897_v13 = vsub.s32 0, %v921_v12 }
 0x1a2   :  { %v603_v27 = vadd.f32 %v602_v24, %v601_v22  ;;  %v615_v28 = vrot.slane %v614_v26, 4  ;;  %v2419_v22 = vld [vmem:[#allocation8] sm:$0xff]  }
 0x1a4   :  { %v604_v29 = vrot.slane %v603_v27, 2  ;;  %v616_v30 = vadd.f32 %v615_v28, %v614_v26 }
 0x1a6   :  { %v605_v31 = vadd.f32 %v604_v29, %v603_v27  ;;  %v617_v32 = vrot.slane %v616_v30, 2  ;;  %v2420_v27 = vld [vmem:[#allocation8 + $0x50] sm:$0xff]  }
 0x1a8   :  { %v606_v33 = vrot.slane %v605_v31, 1  ;;  %v618_v34 = vadd.f32 %v617_v32, %v616_v30 }
 0x1aa   :  { %v607_v35 = vadd.f32 %v606_v33, %v605_v31  ;;  %v619_v36 = vrot.slane %v618_v34, 1 }
 0x1ac   :  { %2217 = vmatmul.mubr.f32.vlgmr.msra.gmra.mxu1 %v607_v35  ;;  %v620_v37 = vadd.f32 %v619_v36, %v618_v34  ;;  %v2421_v35 = vld [vmem:[#allocation8 + $0x40] sm:$0xff]  }
 0x1ad   :  { %1163 = vmatpush1.bf16.msra.mxu1 %v2408_v59 }
 0x1ae   :  { %2252 = vmatmul.mubr.f32.vlgmr.msra.gmra.mxu0 %v620_v37  ;;  %1164 = vmatprep.subr.bf16.mxu1 %v2528_v25 }
 0x1af   :  { %2256 = vmatprep.mubr.msk.f32.mxu0 %vm2530_vm7, %v2526_v4  ;;  %2255 = vmatpush3.msra.mxu0 %v596_v38 }
 0x1b0   :  { %2259 = vmatprep.subr.mxu0 %v2526_v4 }
 0x1b1   :  { %1165 = vmatpush1.bf16.msra.mxu1 %v2410_v61 }
 0x1b2   :  { %1166 = vmatprep.subr.bf16.mxu1 %v2528_v25 }
 0x1b5   :  { %1167 = vmatpush1.bf16.msra.mxu1 %v2412_v0 }
 0x1b6   :  { %1168 = vmatprep.subr.bf16.mxu1 %v2528_v25 }
 0x1b9   :  { %1169 = vmatpush1.bf16.msra.mxu1 %v2414_v3 }
 0x1ba   :  { %1170 = vmatprep.subr.bf16.mxu1 %v2528_v25 }
 0x1bd   :  { %1171 = vmatpush1.bf16.msra.mxu1 %v2416_v8 }
 0x1be   :  { %1172 = vmatprep.subr.bf16.mxu1 %v2528_v25 }
 0x1c1   :  { %1173 = vmatpush1.bf16.msra.mxu1 %v2418_v18 }
 0x1c2   :  { %1174 = vmatprep.subr.bf16.mxu1 %v2528_v25 }
 0x1c5   :  { %1175 = vmatpush1.bf16.msra.mxu1 %v2420_v27 }
 0x1c6   :  { %1176 = vmatprep.subr.bf16.mxu1 %v2528_v25 }
 0x26c   :  { %v687_v41 = vpop.f32.mrf.mxu1 }
 0x26d   :  { %v761_v42 = vmul.f32 0.001953125, %v687_v41  ;;  %v2423_v41 = vld [vmem:[#allocation8 + $0x88] sm:$0xff]  }
 0x26e   :  { %v2218_v43 = vpop.f32.mrf.mxu1  ;;  %v757_v44 = vpop.f32.mrf.mxu0 }
 0x26f   :  { %v762_v45 = vmul.f32 512.0, %v761_v42 }
 0x270   :  { %v2253_v46 = vpop.f32.mrf.mxu0 }
 0x271   :  { %v763_v47 = vmul.f32 %v762_v45, %v761_v42 }
 0x273   :  { %v764_v48 = vsub.f32 %v757_v44, %v763_v47 }
 0x275   :  { %v765_v49 = vmul.f32 0.0019569471, %v764_v48 }
 0x277   :  { %v766_v50 = vmax.f32 %v765_v49, 1e-06 }
 0x279   :  { %2433 = vrsqrt.f32 %v766_v50 }
 0x286   :  { %v2434_v52 = vpop.eup %2433 }
 0x287   :  { %v769_v53 = vmul.f32 %v2434_v52, %v768_v51 }
 0x289   :  { %2257 = vmatmul.mubr.msk.f32.vlgmr.msra.gmra.mxu0 %vm773_vm8, %v769_v53  ;;  %v770_v55 = vmul.f32 %v769_v53, %v761_v42 }
 0x28a   :  { %2260 = vmatpush3.msra.mxu0 %v596_v38  ;;  %2261 = vmatprep.mubr.msk.f32.mxu0 %vm2530_vm7, %v2526_v4 }
 0x28b   :  { %v772_v56 = vsub.f32 %v771_v54, %v770_v55  ;;  %1271 = vmatprep.subr.bf16.mxu0 %v2528_v25 }
 0x28d   :  { %2262 = vmatmul.mubr.msk.f32.vlgmr.msra.gmra.mxu0 %vm773_vm8, %v772_v56 }
 0x28e   :  { %1272 = vmatpush1.bf16.msra.mxu0 %v2406_v57 }
 0x28f   :  { %1273 = vmatprep.subr.bf16.mxu0 %v2528_v25 }
 0x292   :  { %1274 = vmatpush1.bf16.msra.mxu0 %v2407_v60 }
 0x293   :  { %1275 = vmatprep.subr.bf16.mxu0 %v2528_v25 }
 0x296   :  { %1276 = vmatpush1.bf16.msra.mxu0 %v2409_v63 }
 0x297   :  { %1277 = vmatprep.subr.bf16.mxu0 %v2528_v25 }
 0x29a   :  { %1278 = vmatpush1.bf16.msra.mxu0 %v2411_v2 }
 0x29b   :  { %1279 = vmatprep.subr.bf16.mxu0 %v2528_v25 }
 0x29e   :  { %1280 = vmatpush1.bf16.msra.mxu0 %v2413_v5 }
 0x29f   :  { %1281 = vmatprep.subr.bf16.mxu0 %v2528_v25 }
 0x2a2   :  { %1282 = vmatpush1.bf16.msra.mxu0 %v2415_v9 }
 0x2a3   :  { %1283 = vmatprep.subr.bf16.mxu0 %v2528_v25 }
 0x2a6   :  { %1284 = vmatpush1.bf16.msra.mxu0 %v2417_v15 }
 0x2a7   :  { %1285 = vmatprep.subr.bf16.mxu0 %v2528_v25 }
 0x2aa   :  { %1286 = vmatpush1.bf16.msra.mxu0 %v2419_v22 }
 0x2ab   :  { %1301 = vmatprep.subr.bf16.mxu0 %v2528_v25 }
 0x2ae   :  { %1302 = vmatpush2.bf16.msra.mxu0 %v2421_v35 }
 0x2af   :  { %2264 = vmatprep.subr.mxu0 %v2526_v4 }
 0x349   :  { %v843_v14 = vpop.f32.mrf.mxu0 }
 0x34a   :  { %v923_v17 = vrot.slane %v843_v14, %v2897_v13 }
 0x34b   :  { %v2258_v19 = vpop.f32.mrf.mxu0 }
 0x34c   :  { %v924_v24 = vmul.f32 %v923_v17, %v2841_v6  ;;  %v925_v26 = vmul.f32 %v923_v17, %v2839_v1  ;;  %v926_v29 = vmul.f32 %v923_v17, %v2847_v10  ;;  %v927_v30 = vmul.f32 %v923_v17, %v2858_v20  ;;  %v2422_v1 = vld [vmem:[#allocation8 + $0x48] sm:$0xff]  }
 0x34d   :  { %v916_v21 = vpop.f32.mrf.mxu0  ;;  %1177 = vmatpush1.bf16.msra.mxu1 %v2422_v1  ;;  %v2424_v19 = vld [vmem:[#allocation8 + $0xc8] sm:$0xff]  }
 0x34e   :  { %v931_v23 = vrot.slane %v916_v21, %v2897_v13  ;;  %1192 = vmatprep.subr.bf16.mxu1 %v2528_v25 }
 0x34f   :  { %v2263_v28 = vpop.f32.mrf.mxu0 }
 0x350   :  { %v932_v31 = vadd.f32 %v931_v23, %v924_v24  ;;  %v933_v32 = vadd.f32 %v931_v23, %v925_v26  ;;  %v934_v33 = vadd.f32 %v931_v23, %v926_v29  ;;  %v935_v34 = vadd.f32 %v931_v23, %v927_v30 }
 0x351   :  { %1193 = vmatpush2.bf16.msra.mxu1 %v2423_v41 }
 0x352   :  { %v936_v6 = vmax.f32 %v932_v31, 0.0  ;;  %v937_v36 = vmax.f32 %v933_v32, 0.0  ;;  %v938_v20 = vmax.f32 %v934_v33, 0.0  ;;  %v939_v38 = vmax.f32 %v935_v34, 0.0  ;;  %1448 = vmatprep.subr.bf16.mxu1 %v2528_v25 }
 0x354   :  { %v959_v37 = vrot.slane %v936_v6, 7  ;;  %v960_v10 = vrot.slane %v937_v36, 7  ;;  %v962_v43 = vrot.slane %v938_v20, 7  ;;  %v963_v44 = vrot.slane %v939_v38, 7  ;;  %v2425_v38 = vld [vmem:[#allocation8 + $0xc0] sm:$0xff]  }
 0x356   :  { %965 = vrot.lane.b32.xlu0 %v959_v37, %s2519_s13  ;;  %v961_v42 = vsel %vm958_vm11, %v959_v37, %v960_v10  ;;  %v964_v45 = vsel %vm958_vm11, %v962_v43, %v963_v44 }
 0x357   :  { %967 = vrot.lane.b32.xlu1 %v961_v42, %s2519_s13 }
 0x35a   :  { %969 = vrot.lane.b32.xlu0 %v960_v10, %s2519_s13 }
 0x35b   :  { %971 = vrot.lane.b32.xlu1 %v962_v43, %s2519_s13 }
 0x35e   :  { %973 = vrot.lane.b32.xlu0 %v964_v45, %s2519_s13 }
 0x35f   :  { %975 = vrot.lane.b32.xlu1 %v963_v44, %s2519_s13 }
 0x3c8   :  { %v966_v46 = vpop.permute.xlu0 %965 }
 0x3c9   :  { %984 = vst.msk [vmem:[#allocation3] sm:$0xfe] %vm983_vm12, %v966_v46  ;;  %v968_v47 = vpop.permute.xlu1 %967 }
 0x3ca   :  { %986 = vst.msk [vmem:[#allocation3 + $0x8] sm:$0xfe] %vm985_vm13, %v966_v46 }
 0x3cb   :  { %988 = vst.msk [vmem:[#allocation3 + $0x10] sm:$0xff] %vm987_vm14, %v968_v47 }
 0x3cc   :  { %989 = vst.msk [vmem:[#allocation3 + $0x18] sm:$0xff] %vm773_vm8, %v968_v47  ;;  %v970_v48 = vpop.permute.xlu0 %969 }
 0x3cd   :  { %991 = vst.msk [vmem:[#allocation3 + $0x20] sm:$0x1] %vm990_vm15, %v970_v48  ;;  %v972_v49 = vpop.permute.xlu1 %971 }
 0x3ce   :  { %993 = vst.msk [vmem:[#allocation3 + $0x28] sm:$0x1] %vm992_vm0, %v970_v48  ;;  %v2426_v48 = vld [vmem:[#allocation8 + $0xb8] sm:$0xff]  }
 0x3cf   :  { %994 = vst.msk [vmem:[#allocation3 + $0x30] sm:$0xfe] %vm983_vm12, %v972_v49 }
 0x3d0   :  { %995 = vst.msk [vmem:[#allocation3 + $0x38] sm:$0xfe] %vm985_vm13, %v972_v49  ;;  %v974_v50 = vpop.permute.xlu0 %973  ;;  %v1000_v52 = vld [vmem:[#allocation3] sm:$0xff] }
 0x3d1   :  { %v1001_v51 = vld [vmem:[#allocation3 + $0x8] sm:$0xff]  ;;  %996 = vst.msk [vmem:[#allocation3 + $0x40] sm:$0xff] %vm987_vm14, %v974_v50  ;;  %v976_v54 = vpop.permute.xlu1 %975  ;;  %v1030_v57 = vld [vmem:[#allocation3] sm:$0xfe] }
 0x3d2   :  { %v1031_v53 = vld [vmem:[#allocation3 + $0x8] sm:$0xfe]  ;;  %997 = vst.msk [vmem:[#allocation3 + $0x48] sm:$0xff] %vm773_vm8, %v974_v50  ;;  %v2930_v56 = vld [vmem:[#allocation3 + $0x10] sm:$0xff]  ;;  %v1051_v2 = vrot.slane %v1030_v57, 1 }
 0x3d3   :  { %v2928_v55 = vld [vmem:[#allocation3 + $0x18] sm:$0xff]  ;;  %998 = vst.msk [vmem:[#allocation3 + $0x50] sm:$0x1] %vm990_vm15, %v976_v54  ;;  %v1008_v60 = vpack.c.bf16 %v2930_v56, %v1000_v52  ;;  %v1052_v63 = vrot.slane %v2930_v56, 1  ;;  %v1054_v0 = vrot.slane %v1031_v53, 1  ;;  %v2427_v52 = vld [vmem:[#allocation8 + $0xb0] sm:$0xff]  }
 0x3d4   :  { %999 = vst.msk [vmem:[#allocation3 + $0x58] sm:$0x1] %vm992_vm0, %v976_v54  ;;  %v1009_v59 = vpack.c.bf16 %v2928_v55, %v1001_v51  ;;  %v1055_v61 = vrot.slane %v2928_v55, 1  ;;  %v1032_v5 = vld [vmem:[#allocation3 + $0x20] sm:$0x1]  ;;  %v1341_v42 = vrot.slane %v2928_v55, 2 }
 0x3d5   :  { %v1033_v3 = vld [vmem:[#allocation3 + $0x28] sm:$0x1]  ;;  %v1057_v9 = vrot.slane %v1032_v5, 1  ;;  %v1053_v15 = vsel %vm1050_vm1, %v1051_v2, %v1052_v63  ;;  %v1321_v36 = vld [vmem:[#allocation3 + $0x8] sm:$0xfc]  ;;  %v2429_v54 = vld [vmem:[#allocation8 + $0xa0] sm:$0xff]  }
 0x3d6   :  { %2091 = vmatprep.mubr.msk.bf16.mxu0 %vm941_vm9, %v1009_v59  ;;  %v1059_v8 = vrot.slane %v1033_v3, 1  ;;  %v1056_v12 = vsel %vm1050_vm1, %v1054_v0, %v1055_v61  ;;  %v1323_v21 = vld [vmem:[#allocation3 + $0x28] sm:$0x3]  ;;  %v1034_v27 = vld [vmem:[#allocation3 + $0x30] sm:$0xfe]  ;;  %v1340_v44 = vrot.slane %v1321_v36, 2 }
 0x3d7   :  { %1304 = vmatmul.mubr.bf16.vlgmr.msra.gmra.mxu0 %v1008_v60  ;;  %v1035_v11 = vld [vmem:[#allocation3 + $0x38] sm:$0xfe]  ;;  %v1058_v17 = vsel %vm1050_vm1, %v1052_v63, %v1057_v9  ;;  %v1004_v33 = vld [vmem:[#allocation3 + $0x30] sm:$0xff]  ;;  %v1345_v10 = vrot.slane %v1323_v21, 2  ;;  %v1061_v41 = vrot.slane %v1034_v27, 1  ;;  %v2428_v53 = vld [vmem:[#allocation8 + $0xa8] sm:$0xff]  }
 0x3d8   :  { %v1060_v14 = vsel %vm1050_vm1, %v1055_v61, %v1059_v8  ;;  %v1005_v18 = vld [vmem:[#allocation3 + $0x38] sm:$0xff]  ;;  %v1079_v23 = vpack.c.bf16 %v1058_v17, %v1053_v15  ;;  %v2945_v26 = vld [vmem:[#allocation3 + $0x40] sm:$0xff]  ;;  %v1064_v31 = vrot.slane %v1035_v11, 1  ;;  %v1342_v50 = vsel %vm1336_vm2, %v1340_v44, %v1341_v42  ;;  %v2431_v59 = vld [vmem:[#allocation8 + $0x90] sm:$0xff]  }
 0x3d9   :  { %v1080_v22 = vpack.c.bf16 %v1060_v14, %v1056_v12  ;;  %v2943_v24 = vld [vmem:[#allocation3 + $0x48] sm:$0xff]  ;;  %v1062_v34 = vrot.slane %v2945_v26, 1  ;;  %v1010_v1 = vpack.c.bf16 %v2945_v26, %v1004_v33  ;;  %v1346_v47 = vsel %vm1336_vm2, %v1341_v42, %v1345_v10  ;;  %v2430_v55 = vld [vmem:[#allocation8 + $0x98] sm:$0xff]   ;;  %v1322_v57 = vld [vmem:[#allocation3 + $0x20] sm:$0x3] }
 0x3da   :  { %v1011_v28 = vpack.c.bf16 %v2943_v24, %v1005_v18  ;;  %v1065_v29 = vrot.slane %v2943_v24, 1  ;;  %v1036_v32 = vld [vmem:[#allocation3 + $0x50] sm:$0x1]  ;;  %v1366_v51 = vpack.c.bf16 %v1346_v47, %v1342_v50  ;;  %v1320_v61 = vld [vmem:[#allocation3] sm:$0xfc]  ;;  %v1343_v63 = vrot.slane %v1322_v57, 2 }
 0x3db   :  { %v1037_v30 = vld [vmem:[#allocation3 + $0x58] sm:$0x1]  ;;  %2080 = vmatprep.mubr.msk.bf16.mxu1 %vm941_vm9, %v1080_v22  ;;  %v1067_v6 = vrot.slane %v1036_v32, 1  ;;  %v1063_v45 = vsel %vm1050_vm1, %v1061_v41, %v1062_v34  ;;  %v1325_v0 = vld [vmem:[#allocation3 + $0x38] sm:$0xfc]  ;;  %v1351_v2 = vrot.slane %v2943_v24, 2 }
 0x3dc   :  { %v1069_v35 = vrot.slane %v1037_v30, 1  ;;  %1195 = vmatmul.mubr.bf16.vlgmr.msra.gmra.mxu1 %v1079_v23  ;;  %2092 = vmatprep.mubr.msk.bf16.mxu0 %vm941_vm9, %v1011_v28  ;;  %v1066_v37 = vsel %vm1050_vm1, %v1064_v31, %v1065_v29  ;;  %v1327_v60 = vld [vmem:[#allocation3 + $0x58] sm:$0x3]  ;;  %v1338_v5 = vrot.slane %v2930_v56, 2  ;;  %v2432_v8 = vld [vmem:[#allocation8 + $0xd0] sm:$0xff]   ;;  %v1337_v9 = vrot.slane %v1320_v61, 2 }
 0x3dd   :  { %1449 = vmatpush1.bf16.msra.mxu1 %v2424_v19  ;;  %v1068_v46 = vsel %vm1050_vm1, %v1062_v34, %v1067_v6  ;;  %v1355_v3 = vrot.slane %v1327_v60, 2  ;;  %v1350_v11 = vrot.slane %v1325_v0, 2  ;;  %v1326_v17 = vld [vmem:[#allocation3 + $0x50] sm:$0x3]  ;;  %v1324_v21 = vld [vmem:[#allocation3 + $0x30] sm:$0xfc] }
 0x3de   :  { %v1070_v20 = vsel %vm1050_vm1, %v1065_v29, %v1069_v35  ;;  %1450 = vmatprep.subr.bf16.mxu1 %v2528_v25  ;;  %v1081_v49 = vpack.c.bf16 %v1068_v46, %v1063_v45  ;;  %v1344_v12 = vsel %vm1336_vm2, %v1338_v5, %v1343_v63  ;;  %v1339_v18 = vsel %vm1336_vm2, %v1337_v9, %v1338_v5  ;;  %v1516_v29 = vld [vmem:[%s3151_s6 + $0x78] sm:$0xff]  ;;  %v1514_v30 = vld [vmem:[%s3151_s6 + $0x68] sm:$0xff]  ;;  %v1513_v31 = vld [vmem:[%s3151_s6 + $0x60] sm:$0xff] }
 0x3df   :  { %1312 = vmatmul.mubr.bf16.gmra.mxu0 %v1010_v1  ;;  %v1082_v43 = vpack.c.bf16 %v1070_v20, %v1066_v37  ;;  %v1352_v14 = vsel %vm1336_vm2, %v1350_v11, %v1351_v2  ;;  %v1356_v15 = vsel %vm1336_vm2, %v1351_v2, %v1355_v3  ;;  %v1365_v19 = vpack.c.bf16 %v1344_v12, %v1339_v18  ;;  %v1512_v32 = vld [vmem:[%s3151_s6 + $0x58] sm:$0xff]  ;;  %v1511_v33 = vld [vmem:[%s3151_s6 + $0x50] sm:$0xff]  ;;  %v1510_v34 = vld [vmem:[%s3151_s6 + $0x48] sm:$0xff] }
 0x3e0   :  { %2296 = vmatprep.mubr.msk.f32.mxu0 %vm2530_vm7, %v2526_v4  ;;  %v1348_v56 = vrot.slane %v2945_v26, 2  ;;  %v1368_v22 = vpack.c.bf16 %v1356_v15, %v1352_v14  ;;  %v1353_v23 = vrot.slane %v1326_v17, 2  ;;  %2265 = vmatpush3.msra.mxu0 %v1516_v29  ;;  %v1515_v26 = vld [vmem:[%s3151_s6 + $0x70] sm:$0xff]  ;;  %v1509_v35 = vld [vmem:[%s3151_s6 + $0x40] sm:$0xff]  ;;  %v1508_v6 = vld [vmem:[%s3151_s6 + $0x38] sm:$0xff] }
 0x3e1   :  { %2081 = vmatprep.mubr.msk.bf16.mxu1 %vm941_vm9, %v1082_v43  ;;  %1451 = vmatpush1.bf16.msra.mxu1 %v2425_v38  ;;  %v1507_v36 = vld [vmem:[%s3151_s6 + $0x30] sm:$0xff]  ;;  %v1506_v1 = vld [vmem:[%s3151_s6 + $0x28] sm:$0xff]  ;;  %v1505_v37 = vld [vmem:[%s3151_s6 + $0x20] sm:$0xff] }
 0x3e2   :  { %1452 = vmatprep.subr.bf16.mxu1 %v2528_v25  ;;  %v1354_v27 = vsel %vm1336_vm2, %v1348_v56, %v1353_v23  ;;  %2266 = vmatprep.subr.mxu0 %v2526_v4  ;;  %v1504_v10 = vld [vmem:[%s3151_s6 + $0x18] sm:$0xff]  ;;  %v1503_v20 = vld [vmem:[%s3151_s6 + $0x10] sm:$0xff]  ;;  %v1502_v38 = vld [vmem:[%s3151_s6 + $0x8] sm:$0xff] }
 0x3e3   :  { %2267 = vmatpush3.msra.mxu0 %v1515_v26  ;;  %v1501_v41 = vld [vmem:[%s3151_s6] sm:$0xff] }
 0x3e4   :  { %1203 = vmatmul.mubr.bf16.gmra.mxu1 %v1081_v49  ;;  %2268 = vmatprep.subr.mxu0 %v2526_v4 }
 0x3e5   :  { %1453 = vmatpush1.bf16.msra.mxu1 %v2426_v48  ;;  %2102 = vmatprep.mubr.msk.bf16.mxu1 %vm941_vm9, %v1366_v51 }
 0x3e6   :  { %1454 = vmatprep.subr.bf16.mxu1 %v2528_v25  ;;  %2269 = vmatpush3.msra.mxu0 %v1514_v30 }
 0x3e7   :  { %2270 = vmatprep.subr.mxu0 %v2526_v4 }
 0x3e8   :  { %2271 = vmatpush3.msra.mxu0 %v1513_v31 }
 0x3e9   :  { %1455 = vmatpush1.bf16.msra.mxu1 %v2427_v52  ;;  %2272 = vmatprep.subr.mxu0 %v2526_v4 }
 0x3ea   :  { %1456 = vmatprep.subr.bf16.mxu1 %v2528_v25  ;;  %2273 = vmatpush3.msra.mxu0 %v1512_v32 }
 0x3eb   :  { %2274 = vmatprep.subr.mxu0 %v2526_v4 }
 0x3ec   :  { %2275 = vmatpush3.msra.mxu0 %v1511_v33 }
 0x3ed   :  { %1457 = vmatpush1.bf16.msra.mxu1 %v2428_v53  ;;  %2276 = vmatprep.subr.mxu0 %v2526_v4 }
 0x3ee   :  { %1458 = vmatprep.subr.bf16.mxu1 %v2528_v25  ;;  %2277 = vmatpush3.msra.mxu0 %v1510_v34 }
 0x3ef   :  { %2278 = vmatprep.subr.mxu0 %v2526_v4 }
 0x3f0   :  { %2279 = vmatpush3.msra.mxu0 %v1509_v35 }
 0x3f1   :  { %1459 = vmatpush1.bf16.msra.mxu1 %v2429_v54  ;;  %2280 = vmatprep.subr.mxu0 %v2526_v4 }
 0x3f2   :  { %1460 = vmatprep.subr.bf16.mxu1 %v2528_v25  ;;  %2281 = vmatpush3.msra.mxu0 %v1508_v6 }
 0x3f3   :  { %2282 = vmatprep.subr.mxu0 %v2526_v4 }
 0x3f4   :  { %2283 = vmatpush3.msra.mxu0 %v1507_v36 }
 0x3f5   :  { %1461 = vmatpush1.bf16.msra.mxu1 %v2430_v55  ;;  %2284 = vmatprep.subr.mxu0 %v2526_v4 }
 0x3f6   :  { %1462 = vmatprep.subr.bf16.mxu1 %v2528_v25  ;;  %2285 = vmatpush3.msra.mxu0 %v1506_v1 }
 0x3f7   :  { %2286 = vmatprep.subr.mxu0 %v2526_v4 }
 0x3f8   :  { %2287 = vmatpush3.msra.mxu0 %v1505_v37 }
 0x3f9   :  { %1463 = vmatpush1.bf16.msra.mxu1 %v2431_v59  ;;  %2288 = vmatprep.subr.mxu0 %v2526_v4 }
 0x3fa   :  { %1478 = vmatprep.subr.bf16.mxu1 %v2528_v25  ;;  %v1347_v25 = vrot.slane %v1324_v21, 2  ;;  %2289 = vmatpush3.msra.mxu0 %v1504_v10 }
 0x3fb   :  { %2290 = vmatprep.subr.mxu0 %v2526_v4 }
 0x3fc   :  { %v1349_v24 = vsel %vm1336_vm2, %v1347_v25, %v1348_v56  ;;  %2291 = vmatpush3.msra.mxu0 %v1503_v20 }
 0x3fd   :  { %1479 = vmatpush2.bf16.msra.mxu1 %v2432_v8  ;;  %v1367_v28 = vpack.c.bf16 %v1354_v27, %v1349_v24  ;;  %2292 = vmatprep.subr.mxu0 %v2526_v4 }
 0x3fe   :  { %2299 = vmatprep.subr.mxu1 %v2526_v4  ;;  %2293 = vmatpush3.msra.mxu0 %v1502_v38 }
 0x3ff   :  { %2294 = vmatprep.subr.mxu0 %v2526_v4 }
 0x400   :  { %1481 = vmatmul.mubr.bf16.vlgmr.msra.gmra.mxu1 %v1365_v19  ;;  %2295 = vmatpush3.msra.mxu0 %v1501_v41 }
 0x401   :  { %2103 = vmatprep.mubr.msk.bf16.mxu1 %vm941_vm9, %v1368_v22  ;;  %2300 = vmatpush3.msra.mxu1 %v1516_v29 }
 0x402   :  { %2301 = vmatprep.subr.mxu1 %v2526_v4  ;;  %2334 = vmatprep.subr.mxu0 %v2526_v4 }
 0x403   :  { %2302 = vmatpush3.msra.mxu1 %v1515_v26 }
 0x404   :  { %2303 = vmatprep.subr.mxu1 %v2526_v4 }
 0x405   :  { %2304 = vmatpush3.msra.mxu1 %v1514_v30 }
 0x406   :  { %2305 = vmatprep.subr.mxu1 %v2526_v4 }
 0x407   :  { %2306 = vmatpush3.msra.mxu1 %v1513_v31 }
 0x408   :  { %1489 = vmatmul.mubr.bf16.gmra.mxu1 %v1367_v28  ;;  %2307 = vmatprep.subr.mxu1 %v2526_v4 }
 0x409   :  { %2331 = vmatprep.mubr.msk.f32.mxu1 %vm2530_vm7, %v2526_v4  ;;  %2308 = vmatpush3.msra.mxu1 %v1512_v32 }
 0x40a   :  { %2309 = vmatprep.subr.mxu1 %v2526_v4 }
 0x40b   :  { %2310 = vmatpush3.msra.mxu1 %v1511_v33 }
 0x40c   :  { %2311 = vmatprep.subr.mxu1 %v2526_v4 }
 0x40d   :  { %2312 = vmatpush3.msra.mxu1 %v1510_v34 }
 0x40e   :  { %2313 = vmatprep.subr.mxu1 %v2526_v4 }
 0x40f   :  { %2314 = vmatpush3.msra.mxu1 %v1509_v35 }
 0x410   :  { %2315 = vmatprep.subr.mxu1 %v2526_v4 }
 0x411   :  { %2316 = vmatpush3.msra.mxu1 %v1508_v6 }
 0x412   :  { %2317 = vmatprep.subr.mxu1 %v2526_v4 }
 0x413   :  { %2318 = vmatpush3.msra.mxu1 %v1507_v36 }
 0x414   :  { %2319 = vmatprep.subr.mxu1 %v2526_v4 }
 0x415   :  { %2320 = vmatpush3.msra.mxu1 %v1506_v1 }
 0x416   :  { %2321 = vmatprep.subr.mxu1 %v2526_v4 }
 0x417   :  { %2322 = vmatpush3.msra.mxu1 %v1505_v37 }
 0x418   :  { %2323 = vmatprep.subr.mxu1 %v2526_v4 }
 0x419   :  { %2324 = vmatpush3.msra.mxu1 %v1504_v10 }
 0x41a   :  { %2325 = vmatprep.subr.mxu1 %v2526_v4 }
 0x41b   :  { %2326 = vmatpush3.msra.mxu1 %v1503_v20 }
 0x41c   :  { %2327 = vmatprep.subr.mxu1 %v2526_v4 }
 0x41d   :  { %2328 = vmatpush3.msra.mxu1 %v1502_v38  ;;  %v1517_v38 = vld [vmem:[%s3152_s7] sm:$0xff] }
 0x41e   :  { %2329 = vmatprep.subr.mxu1 %v2526_v4 }
 0x41f   :  { %2330 = vmatpush3.msra.mxu1 %v1501_v41 }
 0x497   :  { %v1305_v42 = vpop.f32.mrf.mxu0 }
 0x499   :  { %v1307_v43 = vpop.f32.mrf.mxu0 }
 0x49b   :  { %v1308_v44 = vpop.f32.mrf.mxu0 }
 0x49c   :  { %v1196_v45 = vpop.f32.mrf.mxu1 }
 0x49d   :  { %v1310_v46 = vpop.f32.mrf.mxu0  ;;  %v1306_v2 = vadd.f32 %v1305_v42, %v1196_v45 }
 0x49e   :  { %v1198_v47 = vpop.f32.mrf.mxu1 }
 0x49f   :  { %v1313_v48 = vpop.f32.mrf.mxu0 }
 0x4a0   :  { %v1199_v49 = vpop.f32.mrf.mxu1 }
 0x4a1   :  { %v1315_v50 = vpop.f32.mrf.mxu0  ;;  %v1309_v63 = vadd.f32 %v1308_v44, %v1199_v49 }
 0x4a2   :  { %v1201_v51 = vpop.f32.mrf.mxu1 }
 0x4a3   :  { %v1316_v52 = vpop.f32.mrf.mxu0  ;;  %v1689_v51 = vstv %s2104_s8 }
 0x4a4   :  { %v1204_v53 = vpop.f32.mrf.mxu1 }
 0x4a5   :  { %v1318_v54 = vpop.f32.mrf.mxu0  ;;  %v1314_v8 = vadd.f32 %v1313_v48, %v1204_v53 }
 0x4a6   :  { %v1206_v55 = vpop.f32.mrf.mxu1  ;;  %v1692_v54 = vstv %s2105_s1 }
 0x4a8   :  { %v1207_v57 = vpop.f32.mrf.mxu1 }
 0x4a9   :  { %v1317_v17 = vadd.f32 %v1316_v52, %v1207_v57 }
 0x4aa   :  { %v1209_v59 = vpop.f32.mrf.mxu1 }
 0x4ab   :  { %v433_v59 = vadd.f32 %v2869_v39, %v2835_v58 }
 0x4c0   :  { %v1482_v60 = vpop.f32.mrf.mxu1 }
 0x4c1   :  { %v3066_v9 = vadd.f32 %v1482_v60, %v1306_v2  ;;  %v2067_v2 = vld [vmem:[%s3148_s3] ss:$0 sm:$0xff]  ;;  %s2531_s3 = smov 112  }
 0x4c2   :  { %v1484_v61 = vpop.f32.mrf.mxu1  ;;  %v576_v39 = vadd.f32 %v2067_v2, %v2837_v62 }
 0x4c3   :  { %v1529_v18 = vmul.f32 %v3066_v9, %v3066_v9 }
 0x4c4   :  { %v1485_v0 = vpop.f32.mrf.mxu1 }
 0x4c5   :  { %v3064_v3 = vadd.f32 %v1485_v0, %v1309_v63  ;;  %v568_v63 = vadd.f32 %v2871_v40, %v433_v59  ;;  %v578_v40 = vadd.f32 %v2067_v2, %v2855_v16 }
 0x4c6   :  { %v1487_v5 = vpop.f32.mrf.mxu1 }
 0x4c7   :  { %v1530_v12 = vmul.f32 %v3064_v3, %v3064_v3  ;;  %v1520_v19 = vadd.f32 %v3064_v3, %v3066_v9 }
 0x4c8   :  { %v1490_v11 = vpop.f32.mrf.mxu1 }
 0x4c9   :  { %v3070_v14 = vadd.f32 %v1490_v11, %v1314_v8  ;;  %v1533_v22 = vadd.f32 %v1530_v12, %v1529_v18 }
 0x4ca   :  { %v1492_v15 = vpop.f32.mrf.mxu1 }
 0x4cb   :  { %v1531_v21 = vmul.f32 %v3070_v14, %v3070_v14  ;;  %v1521_v23 = vadd.f32 %v1520_v19, %v3070_v14  ;;  %v577_v15 = vadd.f32 %v2067_v2, %v2843_v7 }
 0x4cc   :  { %v1493_v56 = vpop.f32.mrf.mxu1 }
 0x4cd   :  { %v1500_v25 = vadd.f32 %v1493_v56, %v1317_v17  ;;  %v1534_v27 = vadd.f32 %v1533_v22, %v1531_v21  ;;  %v579_v17 = vadd.f32 %v2067_v2, %v568_v63 }
 0x4ce   :  { %v1495_v24 = vpop.f32.mrf.mxu1 }
 0x4cf   :  { %v1522_v28 = vadd.f32 %v1521_v23, %v1500_v25  ;;  %v1532_v29 = vmul.f32 %v1500_v25, %v1500_v25 }
 0x4d1   :  { %v1523_v26 = vrot.slane %v1522_v28, 4  ;;  %v1535_v30 = vadd.f32 %v1534_v27, %v1532_v29 }
 0x4d3   :  { %v1524_v31 = vadd.f32 %v1523_v26, %v1522_v28  ;;  %v1536_v32 = vrot.slane %v1535_v30, 4 }
 0x4d5   :  { %v1525_v33 = vrot.slane %v1524_v31, 2  ;;  %v1537_v34 = vadd.f32 %v1536_v32, %v1535_v30 }
 0x4d7   :  { %v1526_v35 = vadd.f32 %v1525_v33, %v1524_v31  ;;  %v1538_v6 = vrot.slane %v1537_v34, 2 }
 0x4d9   :  { %v1527_v36 = vrot.slane %v1526_v35, 1  ;;  %v1539_v1 = vadd.f32 %v1538_v6, %v1537_v34 }
 0x4db   :  { %v1528_v37 = vadd.f32 %v1527_v36, %v1526_v35  ;;  %v1540_v10 = vrot.slane %v1539_v1, 1 }
 0x4dd   :  { %2297 = vmatmul.mubr.f32.vlgmr.msra.gmra.mxu0 %v1528_v37  ;;  %v1541_v20 = vadd.f32 %v1540_v10, %v1539_v1 }
 0x4de   :  { %2336 = vmatprep.mubr.msk.f32.mxu0 %vm2530_vm7, %v2526_v4  ;;  %2335 = vmatpush3.msra.mxu0 %v1517_v38 }
 0x4df   :  { %2332 = vmatmul.mubr.f32.vlgmr.msra.gmra.mxu1 %v1541_v20  ;;  %2339 = vmatprep.subr.mxu0 %v2526_v4 }
 0x59d   :  { %v1608_v41 = vpop.f32.mrf.mxu0 }
 0x59e   :  { %v1682_v42 = vmul.f32 0.001953125, %v1608_v41 }
 0x59f   :  { %v2298_v43 = vpop.f32.mrf.mxu0  ;;  %v1678_v44 = vpop.f32.mrf.mxu1 }
 0x5a0   :  { %v1683_v45 = vmul.f32 512.0, %v1682_v42 }
 0x5a1   :  { %v2333_v46 = vpop.f32.mrf.mxu1 }
 0x5a2   :  { %v1684_v47 = vmul.f32 %v1683_v45, %v1682_v42 }
 0x5a4   :  { %v1685_v48 = vsub.f32 %v1678_v44, %v1684_v47 }
 0x5a6   :  { %v1686_v49 = vmul.f32 0.0019569471, %v1685_v48 }
 0x5a8   :  { %v1687_v50 = vmax.f32 %v1686_v49, 1e-06 }
 0x5aa   :  { %2435 = vrsqrt.f32 %v1687_v50 }
 0x5b7   :  { %v2436_v52 = vpop.eup %2435 }
 0x5b8   :  { %v1690_v53 = vmul.f32 %v2436_v52, %v1689_v51 }
 0x5ba   :  { %2337 = vmatmul.mubr.msk.f32.vlgmr.msra.gmra.mxu0 %vm773_vm8, %v1690_v53  ;;  %v1691_v55 = vmul.f32 %v1690_v53, %v1682_v42 }
 0x5bb   :  { %2340 = vmatpush3.msra.mxu0 %v1517_v38  ;;  %2341 = vmatprep.mubr.msk.f32.mxu0 %vm2530_vm7, %v2526_v4 }
 0x5bc   :  { %v1693_v57 = vsub.f32 %v1692_v54, %v1691_v55 }
 0x5be   :  { %2342 = vmatmul.mubr.msk.f32.vlgmr.msra.gmra.mxu0 %vm773_vm8, %v1693_v57 }
 0x67a   :  { %v1763_v60 = vpop.f32.mrf.mxu0 }
 0x67b   :  { %v1843_v61 = vrot.slane %v1763_v60, %v2897_v13 }
 0x67c   :  { %v2338_v0 = vpop.f32.mrf.mxu0 }
 0x67d   :  { %v1844_v5 = vmul.f32 %v1843_v61, %v3066_v9  ;;  %v1845_v4 = vmul.f32 %v1843_v61, %v3064_v3  ;;  %v1846_v11 = vmul.f32 %v1843_v61, %v3070_v14  ;;  %v1847_v12 = vmul.f32 %v1843_v61, %v1500_v25 }
 0x67e   :  { %v1836_v8 = vpop.f32.mrf.mxu0 }
 0x67f   :  { %v1851_v58 = vrot.slane %v1836_v8, %v2897_v13 }
 0x680   :  { %v2343_v18 = vpop.f32.mrf.mxu0 }
 0x681   :  { %v1852_v19 = vadd.f32 %v1851_v58, %v1844_v5  ;;  %v1853_v21 = vadd.f32 %v1851_v58, %v1845_v4  ;;  %v1854_v56 = vadd.f32 %v1851_v58, %v1846_v11  ;;  %v1855_v9 = vadd.f32 %v1851_v58, %v1847_v12 }
 0x683   :  { %v1856_v22 = vadd.f32 %v1852_v19, %v576_v39  ;;  %v1857_v23 = vadd.f32 %v1853_v21, %v577_v15  ;;  %v1858_v3 = vadd.f32 %v1854_v56, %v578_v40  ;;  %v1859_v24 = vadd.f32 %v1855_v9, %v579_v17 }
 0x685   :  { %v1860_v14 = vmax.f32 %v1856_v22, 0.0  ;;  %v1861_v25 = vmax.f32 %v1857_v23, 0.0  ;;  %v1862_v27 = vmax.f32 %v1858_v3, 0.0  ;;  %v1863_v13 = vmax.f32 %v1859_v24, 0.0 }
 0x687   :  { %1864 = vst.msk [vmem:[#allocation11] sm:$0xff] %vm941_vm9, %v1860_v14  ;;  %1865 = vst.msk [vmem:[#allocation11 + $0x8] sm:$0xff] %vm941_vm9, %v1861_v25  ;;  %1874 = vrot.lane.b32.xlu1 %v1861_v25, %s2531_s3  ;;  %1872 = vrot.lane.b32.xlu0 %v1860_v14, %s2531_s3 }
 0x688   :  { %1866 = vst.msk [vmem:[#allocation11 + $0x80] sm:$0xff] %vm941_vm9, %v1862_v27  ;;  %1867 = vst.msk [vmem:[#allocation11 + $0x88] sm:$0xff] %vm941_vm9, %v1863_v13 }
 0x68b   :  { %1878 = vrot.lane.b32.xlu1 %v1863_v13, %s2531_s3  ;;  %1876 = vrot.lane.b32.xlu0 %v1862_v27, %s2531_s3 }
 0x68f   :  { %1891 = vrot.lane.b32.xlu1 %v1861_v25, %s2532_s26  ;;  %1889 = vrot.lane.b32.xlu0 %v1860_v14, %s2532_s26 }
 0x693   :  { %1895 = vrot.lane.b32.xlu1 %v1863_v13, %s2532_s26  ;;  %1893 = vrot.lane.b32.xlu0 %v1862_v27, %s2532_s26 }
 0x697   :  { %1908 = vrot.lane.b32.xlu1 %v1861_v25, %s2533_s27  ;;  %1906 = vrot.lane.b32.xlu0 %v1860_v14, %s2533_s27 }
 0x69b   :  { %1912 = vrot.lane.b32.xlu1 %v1863_v13, %s2533_s27  ;;  %1910 = vrot.lane.b32.xlu0 %v1862_v27, %s2533_s27 }
 0x69f   :  { %1925 = vrot.lane.b32.xlu1 %v1861_v25, %s2521_s19  ;;  %1923 = vrot.lane.b32.xlu0 %v1860_v14, %s2521_s19 }
 0x6a3   :  { %1929 = vrot.lane.b32.xlu1 %v1863_v13, %s2521_s19  ;;  %1927 = vrot.lane.b32.xlu0 %v1862_v27, %s2521_s19  ;;  %s2537_s19 = smov [#allocation11]  }
 0x6a4   :  { %s1996_s18 = sshll.u32 %s2537_s19, 4  ;;  %s1997_s18 = int_to_ptr.vmem [resolvable:$true] %s1996_s18 }
 0x6a5   :  { %s2489_s25 = scalar_lea.vmem %s1997_s18, 4096  ;;  %p2494_p2 = scmp.lt.s32.totalorder %s1997_s18, %s1997_s18 }
 0x6a6   :  { %p2490_p1 = scmp.ne.s32.totalorder %s1997_s18, %s2489_s25  ;;  %p2495_p3 = scmp.lt.s32.totalorder %s2489_s25, %s2489_s25 }
 0x6a7   :  { %1942 = vrot.lane.b32.xlu1 %v1861_v25, %s2534_s28  ;;  %1940 = vrot.lane.b32.xlu0 %v1860_v14, %s2534_s28 }
 0x6a8   :  { %p2496_p4 = por %p2495_p3, %p2494_p2 }
 0x6aa   :  { %p2497_p5 = pnand %p2496_p4, %p2490_p1 }
 0x6ab   :  { %1946 = vrot.lane.b32.xlu1 %v1863_v13, %s2534_s28  ;;  %1944 = vrot.lane.b32.xlu0 %v1862_v27, %s2534_s28 }
 0x6af   :  { %1959 = vrot.lane.b32.xlu1 %v1861_v25, %s2535_s29  ;;  %1957 = vrot.lane.b32.xlu0 %v1860_v14, %s2535_s29 }
 0x6b3   :  { %1963 = vrot.lane.b32.xlu1 %v1863_v13, %s2535_s29  ;;  %1961 = vrot.lane.b32.xlu0 %v1862_v27, %s2535_s29 }
 0x6b7   :  { %1976 = vrot.lane.b32.xlu1 %v1861_v25, %s2536_s2  ;;  %1974 = vrot.lane.b32.xlu0 %v1860_v14, %s2536_s2 }
 0x6bb   :  { %1980 = vrot.lane.b32.xlu1 %v1863_v13, %s2536_s2  ;;  %1978 = vrot.lane.b32.xlu0 %v1862_v27, %s2536_s2 }
 0x6f9   :  { %v1875_v62 = vpop.permute.xlu1 %1874  ;;  %v1873_v7 = vpop.permute.xlu0 %1872 }
 0x6fa   :  { %1886 = vst.msk [vmem:[#allocation11 + $0x18] sm:$0xff] %vm941_vm9, %v1875_v62  ;;  %1885 = vst.msk [vmem:[#allocation11 + $0x10] sm:$0xff] %vm941_vm9, %v1873_v7 }
 0x6fd   :  { %v1879_v16 = vpop.permute.xlu1 %1878  ;;  %v1877_v28 = vpop.permute.xlu0 %1876 }
 0x6fe   :  { %1888 = vst.msk [vmem:[#allocation11 + $0x98] sm:$0xff] %vm941_vm9, %v1879_v16  ;;  %1887 = vst.msk [vmem:[#allocation11 + $0x90] sm:$0xff] %vm941_vm9, %v1877_v28 }
 0x701   :  { %v1892_v29 = vpop.permute.xlu1 %1891  ;;  %v1890_v26 = vpop.permute.xlu0 %1889 }
 0x702   :  { %1903 = vst.msk [vmem:[#allocation11 + $0x28] sm:$0xff] %vm941_vm9, %v1892_v29  ;;  %1902 = vst.msk [vmem:[#allocation11 + $0x20] sm:$0xff] %vm941_vm9, %v1890_v26 }
 0x705   :  { %v1896_v30 = vpop.permute.xlu1 %1895  ;;  %v1894_v31 = vpop.permute.xlu0 %1893 }
 0x706   :  { %1905 = vst.msk [vmem:[#allocation11 + $0xa8] sm:$0xff] %vm941_vm9, %v1896_v30  ;;  %1904 = vst.msk [vmem:[#allocation11 + $0xa0] sm:$0xff] %vm941_vm9, %v1894_v31 }
 0x709   :  { %v1909_v32 = vpop.permute.xlu1 %1908  ;;  %v1907_v33 = vpop.permute.xlu0 %1906 }
 0x70a   :  { %1920 = vst.msk [vmem:[#allocation11 + $0x38] sm:$0xff] %vm941_vm9, %v1909_v32  ;;  %1919 = vst.msk [vmem:[#allocation11 + $0x30] sm:$0xff] %vm941_vm9, %v1907_v33 }
 0x70d   :  { %v1913_v34 = vpop.permute.xlu1 %1912  ;;  %v1911_v35 = vpop.permute.xlu0 %1910 }
 0x70e   :  { %1922 = vst.msk [vmem:[#allocation11 + $0xb8] sm:$0xff] %vm941_vm9, %v1913_v34  ;;  %1921 = vst.msk [vmem:[#allocation11 + $0xb0] sm:$0xff] %vm941_vm9, %v1911_v35 }
 0x711   :  { %v1926_v6 = vpop.permute.xlu1 %1925  ;;  %v1924_v36 = vpop.permute.xlu0 %1923 }
 0x712   :  { %1937 = vst.msk [vmem:[#allocation11 + $0x48] sm:$0xff] %vm941_vm9, %v1926_v6  ;;  %1936 = vst.msk [vmem:[#allocation11 + $0x40] sm:$0xff] %vm941_vm9, %v1924_v36 }
 0x715   :  { %v1930_v1 = vpop.permute.xlu1 %1929  ;;  %v1928_v37 = vpop.permute.xlu0 %1927 }
 0x716   :  { %1939 = vst.msk [vmem:[#allocation11 + $0xc8] sm:$0xff] %vm941_vm9, %v1930_v1  ;;  %1938 = vst.msk [vmem:[#allocation11 + $0xc0] sm:$0xff] %vm941_vm9, %v1928_v37 }
 0x719   :  { %v1943_v10 = vpop.permute.xlu1 %1942  ;;  %v1941_v20 = vpop.permute.xlu0 %1940 }
 0x71a   :  { %1954 = vst.msk [vmem:[#allocation11 + $0x58] sm:$0xff] %vm941_vm9, %v1943_v10  ;;  %1953 = vst.msk [vmem:[#allocation11 + $0x50] sm:$0xff] %vm941_vm9, %v1941_v20 }
 0x71d   :  { %v1947_v38 = vpop.permute.xlu1 %1946  ;;  %v1945_v41 = vpop.permute.xlu0 %1944 }
 0x71e   :  { %1956 = vst.msk [vmem:[#allocation11 + $0xd8] sm:$0xff] %vm941_vm9, %v1947_v38  ;;  %1955 = vst.msk [vmem:[#allocation11 + $0xd0] sm:$0xff] %vm941_vm9, %v1945_v41 }
 0x721   :  { %v1960_v42 = vpop.permute.xlu1 %1959  ;;  %v1958_v43 = vpop.permute.xlu0 %1957 }
 0x722   :  { %1971 = vst.msk [vmem:[#allocation11 + $0x68] sm:$0xff] %vm941_vm9, %v1960_v42  ;;  %1970 = vst.msk [vmem:[#allocation11 + $0x60] sm:$0xff] %vm941_vm9, %v1958_v43 }
 0x725   :  { %v1964_v44 = vpop.permute.xlu1 %1963  ;;  %v1962_v45 = vpop.permute.xlu0 %1961 }
 0x726   :  { %1973 = vst.msk [vmem:[#allocation11 + $0xe8] sm:$0xff] %vm941_vm9, %v1964_v44  ;;  %1972 = vst.msk [vmem:[#allocation11 + $0xe0] sm:$0xff] %vm941_vm9, %v1962_v45 }
 0x729   :  { %v1977_v46 = vpop.permute.xlu1 %1976  ;;  %v1975_v47 = vpop.permute.xlu0 %1974 }
 0x72a   :  { %1988 = vst.msk [vmem:[#allocation11 + $0x78] sm:$0xff] %vm941_vm9, %v1977_v46  ;;  %1987 = vst.msk [vmem:[#allocation11 + $0x70] sm:$0xff] %vm941_vm9, %v1975_v47 }
 0x72d   :  { %v1981_v48 = vpop.permute.xlu1 %1980  ;;  %v1979_v49 = vpop.permute.xlu0 %1978 }
 0x72e   :  { %1990 = vst.msk [vmem:[#allocation11 + $0xf8] sm:$0xff] %vm941_vm9, %v1981_v48  ;;  %1989 = vst.msk [vmem:[#allocation11 + $0xf0] sm:$0xff] %vm941_vm9, %v1979_v49 }
 0x72f   :  { %2500 = shalt.err (!%p2497_p5)
}
 0x730   :  { %2002 = dma.vmem_to_hbm [thread:$0]  %s1997_s18, 4096, %s3154_s9, [#allocation6], %s2518_s12, %s2518_s12, %s2519_s13  }
 0x731   :  { %2515 = dma.done.wait [#allocation6], 4096  }
 0x732   :  { %2516 = vsyncadd [#allocation6], 4294963200 }
 0x733   :  { %2006 = vsyncpa [#allocation5], 1 }
 0x734   :  { %2007 = vsyncpa [#allocation9], 1 }
 0x735   :  { %2008 = vsyncpa [#allocation6], 1 }
 0x736   :  { %2009 = vsyncpa [#allocation7], 1 }

</bundles_post_ra>
